<compile_context>
chip_gen: v7x
topology: tpu7x:2x2x1
jax: 0.10.0
libtpu: 0.0.40
codegen_flags: <defaults>
</compile_context>

<pallas_src>
import math

import jax
import jax.numpy as jnp
from jax.experimental import pallas as pl
from jax.experimental.pallas import tpu as pltpu

num_classes = 10

# LeNet-5 geometry (fixed by the architecture).
_H0 = 32                    # input spatial size
_K = 5                      # conv kernel size
_C1, _OC1 = 1, 6            # conv1 in/out channels
_C2, _OC2 = 6, 16           # conv2 in/out channels
_H1 = _H0 - _K + 1          # 28 (conv1 output)
_P1 = _H1 // 2              # 14 (pool1 output)
_H2 = _P1 - _K + 1          # 10 (conv2 output)
_P2 = _H2 // 2              # 5  (pool2 output)
_FC1, _FC2 = 120, 84
_NPAD = 128                 # lane-padded logits width


# ------------------------------ Pallas kernel -------------------------------

def _lenet5_kernel(x_ref, c1w_ref, c1b_ref, r1_ref, s1_ref,
                   c2w_ref, c2b_ref, r2_ref, s2_ref,
                   f1w_ref, f1b_ref, f2w_ref, f2b_ref, f3w_ref, f3b_ref,
                   out_ref):
    f32 = jnp.float32
    x = x_ref[0, 0]                                       # (32, 32)

    # conv1 (+bias, ReLU): 5 matmuls over kernel rows, lane-dense (28, 6*28).
    acc1 = jnp.zeros((_H1, _OC1 * _H1), f32)
    for kh in range(_K):
        acc1 = acc1 + jnp.dot(x[kh:kh + _H1, :], c1w_ref[kh],
                              preferred_element_type=f32)
    y1 = jnp.maximum(acc1 + c1b_ref[...], 0.0)

    # maxpool 2x2 via even/odd row & per-channel column selection matmuls.
    rmax = jnp.maximum(jnp.dot(r1_ref[0], y1, preferred_element_type=f32),
                       jnp.dot(r1_ref[1], y1, preferred_element_type=f32))
    p1 = jnp.maximum(jnp.dot(rmax, s1_ref[0], preferred_element_type=f32),
                     jnp.dot(rmax, s1_ref[1], preferred_element_type=f32))
    # p1: (14, 6*14), layout [row, channel*14 + col]

    # conv2 (+bias, ReLU): (10, 16*10).
    acc2 = jnp.zeros((_H2, _OC2 * _H2), f32)
    for kh in range(_K):
        acc2 = acc2 + jnp.dot(p1[kh:kh + _H2, :], c2w_ref[kh],
                              preferred_element_type=f32)
    y2 = jnp.maximum(acc2 + c2b_ref[...], 0.0)

    # maxpool 2x2 -> (5, 16*5).
    rmax2 = jnp.maximum(jnp.dot(r2_ref[0], y2, preferred_element_type=f32),
                        jnp.dot(r2_ref[1], y2, preferred_element_type=f32))
    p2 = jnp.maximum(jnp.dot(rmax2, s2_ref[0], preferred_element_type=f32),
                     jnp.dot(rmax2, s2_ref[1], preferred_element_type=f32))
    # p2[h, c*5 + w] == torch activation [c, h, w] after pool2.

    # fc1 (flatten folded into per-row weight slabs), fc2, fc3 (lane-padded).
    f1 = jnp.dot(p2[0:1, :], f1w_ref[0], preferred_element_type=f32)
    for h in range(1, _P2):
        f1 = f1 + jnp.dot(p2[h:h + 1, :], f1w_ref[h], preferred_element_type=f32)
    f1 = jnp.maximum(f1 + f1b_ref[...], 0.0)              # (1, 120)
    f2 = jnp.maximum(jnp.dot(f1, f2w_ref[...], preferred_element_type=f32)
                     + f2b_ref[...], 0.0)                 # (1, 84)
    f3 = jnp.dot(f2, f3w_ref[...], preferred_element_type=f32) + f3b_ref[...]
    out_ref[0] = f3.astype(out_ref.dtype)                 # (1, 128)


# --------------------------- weight preprocessing ----------------------------

def _banded_conv_weight(wt, width_in):
    """wt: (OC, C, k, k) -> (k, C*Win, OC*Wout) banded GEMM weights.

    banded[kh, c*Win + wi, oc*Wout + ow] = wt[oc, c, kh, wi - ow] if 0 <= wi-ow < k.
    Row-slicing the (rows, C*Win) activation by kh and matmul'ing with banded[kh]
    performs the im2col + channel contraction for kernel row kh in one GEMM.
    """
    oc_n, c_n, k, _ = wt.shape
    width_out = width_in - k + 1
    wi = jnp.arange(width_in)[None, :, None]
    ow = jnp.arange(width_out)[None, None, :]
    kw = jnp.arange(k)[:, None, None]
    sel = (wi == ow + kw).astype(wt.dtype)                # (k, Win, Wout)
    banded = jnp.einsum('xwv,ocyx->ycwov', sel, wt)       # (kh, c, wi, oc, ow)
    return banded.reshape(k, c_n * width_in, oc_n * width_out)


def _pool_selectors(height, width, channels, dtype):
    """Even/odd row and per-channel column selectors for a 2x2 stride-2 max-pool."""
    hp, wp = height // 2, width // 2
    i = jnp.arange(hp)[:, None]
    h = jnp.arange(height)[None, :]
    rows = jnp.stack([(h == 2 * i).astype(dtype),
                      (h == 2 * i + 1).astype(dtype)])             # (2, hp, H)
    w = jnp.arange(width)[:, None]
    j = jnp.arange(wp)[None, :]
    col_even = (w == 2 * j).astype(dtype)                          # (W, Wp)
    col_odd = (w == 2 * j + 1).astype(dtype)
    eye_c = jnp.eye(channels, dtype=dtype)
    cols = jnp.stack([jnp.kron(eye_c, col_even),
                      jnp.kron(eye_c, col_odd)])                   # (2, C*W, C*Wp)
    return rows, cols


# ------------------------------- forward pass --------------------------------

def lenet5_forward(params, x):
    """x: (B, 1, 32, 32) float32 -> (B, num_classes)."""
    B = x.shape[0]
    f32 = jnp.float32
    x = x.astype(f32)

    c1w = _banded_conv_weight(params['conv1_w'].astype(f32), _H0)   # (5, 32, 168)
    c1b = jnp.repeat(params['conv1_b'].astype(f32), _H1)[None, :]   # (1, 168)
    r1, s1 = _pool_selectors(_H1, _H1, _OC1, f32)                   # (2,14,28),(2,168,84)
    c2w = _banded_conv_weight(params['conv2_w'].astype(f32), _P1)   # (5, 84, 160)
    c2b = jnp.repeat(params['conv2_b'].astype(f32), _H2)[None, :]   # (1, 160)
    r2, s2 = _pool_selectors(_H2, _H2, _OC2, f32)                   # (2,5,10),(2,160,80)

    # fc1 weights permuted so the in-kernel (h, c*5+w) layout matches torch's
    # .view(-1, 400) flatten order (c*25 + h*5 + w).
    f1w = params['fc1_w'].astype(f32).reshape(_FC1, _OC2, _P2, _P2)
    f1w = f1w.transpose(2, 1, 3, 0).reshape(_P2, _OC2 * _P2, _FC1)  # (5, 80, 120)
    f1b = params['fc1_b'].astype(f32)[None, :]                      # (1, 120)
    f2w = params['fc2_w'].astype(f32).T                             # (120, 84)
    f2b = params['fc2_b'].astype(f32)[None, :]                      # (1, 84)
    f3w = jnp.zeros((_FC2, _NPAD), f32).at[:, :num_classes].set(
        params['fc3_w'].astype(f32).T)                              # (84, 128)
    f3b = jnp.zeros((1, _NPAD), f32).at[:, :num_classes].set(
        params['fc3_b'].astype(f32)[None, :])                       # (1, 128)

    weights = (c1w, c1b, r1, s1, c2w, c2b, r2, s2,
               f1w, f1b, f2w, f2b, f3w, f3b)

    def _full(a):
        # Whole-array block, same block index every grid step (fetched once).
        return pl.BlockSpec(a.shape, lambda b, _nd=a.ndim: (0,) * _nd)

    out = pl.pallas_call(
        _lenet5_kernel,
        out_shape=jax.ShapeDtypeStruct((B, 1, _NPAD), f32),
        grid=(B,),
        in_specs=[pl.BlockSpec((1, 1, _H0, _H0), lambda b: (b, 0, 0, 0))]
                 + [_full(a) for a in weights],
        out_specs=pl.BlockSpec((1, 1, _NPAD), lambda b: (b, 0, 0)),
        compiler_params=pltpu.CompilerParams(
            dimension_semantics=("parallel",)),
    )(x, *weights)

    return out[:, 0, :num_classes]


# ------------------------------- reference -----------------------------------

def _lenet5_reference(params, x):
    dn = ('NCHW', 'OIHW', 'NCHW')
    hi = jax.lax.Precision.HIGHEST
    y = jax.lax.conv_general_dilated(x, params['conv1_w'], (1, 1), 'VALID',
                                     dimension_numbers=dn, precision=hi)
    y = jnp.maximum(y + params['conv1_b'][None, :, None, None], 0.0)
    y = jax.lax.reduce_window(y, -jnp.inf, jax.lax.max,
                              (1, 1, 2, 2), (1, 1, 2, 2), 'VALID')
    y = jax.lax.conv_general_dilated(y, params['conv2_w'], (1, 1), 'VALID',
                                     dimension_numbers=dn, precision=hi)
    y = jnp.maximum(y + params['conv2_b'][None, :, None, None], 0.0)
    y = jax.lax.reduce_window(y, -jnp.inf, jax.lax.max,
                              (1, 1, 2, 2), (1, 1, 2, 2), 'VALID')
    y = y.reshape(y.shape[0], -1)
    y = jnp.maximum(y @ params['fc1_w'].T + params['fc1_b'], 0.0)
    y = jnp.maximum(y @ params['fc2_w'].T + params['fc2_b'], 0.0)
    return y @ params['fc3_w'].T + params['fc3_b']


def _init_params(key):
    def uniform(k, shape, fan_in):
        bound = 1.0 / math.sqrt(fan_in)
        return jax.random.uniform(k, shape, jnp.float32, -bound, bound)

    ks = jax.random.split(key, 10)
    return {
        'conv1_w': uniform(ks[0], (6, 1, 5, 5), 25),
        'conv1_b': uniform(ks[1], (6,), 25),
        'conv2_w': uniform(ks[2], (16, 6, 5, 5), 150),
        'conv2_b': uniform(ks[3], (16,), 150),
        'fc1_w': uniform(ks[4], (120, 400), 400),
        'fc1_b': uniform(ks[5], (120,), 400),
        'fc2_w': uniform(ks[6], (84, 120), 120),
        'fc2_b': uniform(ks[7], (84,), 120),
        'fc3_w': uniform(ks[8], (num_classes, 84), 84),
        'fc3_b': uniform(ks[9], (num_classes,), 84),
    }


if __name__ == '__main__':
    key = jax.random.PRNGKey(0)
    pkey, xkey = jax.random.split(key)
    params = _init_params(pkey)
    x = jax.random.normal(xkey, (2, 1, 32, 32), jnp.float32)

    out = jax.block_until_ready(jax.jit(lenet5_forward)(params, x))
    assert out.shape == (2, num_classes)

    ref = jax.block_until_ready(jax.jit(_lenet5_reference)(params, x))
    err = float(jnp.max(jnp.abs(out - ref)))
    assert jnp.allclose(out, ref, atol=2e-2, rtol=2e-2), err

    print("KERNEL_OK")
</pallas_src>

<mosaic_0001>
module attributes {stable_mosaic.version = 11 : i64} {
  func.func @_lenet5_kernel(%arg0: i32, %arg1: memref<1x1x32x32xf32, #tpu.memory_space<vmem>>, %arg2: memref<5x32x168xf32, #tpu.memory_space<vmem>>, %arg3: memref<1x168xf32, #tpu.memory_space<vmem>>, %arg4: memref<2x14x28xf32, #tpu.memory_space<vmem>>, %arg5: memref<2x168x84xf32, #tpu.memory_space<vmem>>, %arg6: memref<5x84x160xf32, #tpu.memory_space<vmem>>, %arg7: memref<1x160xf32, #tpu.memory_space<vmem>>, %arg8: memref<2x5x10xf32, #tpu.memory_space<vmem>>, %arg9: memref<2x160x80xf32, #tpu.memory_space<vmem>>, %arg10: memref<5x80x120xf32, #tpu.memory_space<vmem>>, %arg11: memref<1x120xf32, #tpu.memory_space<vmem>>, %arg12: memref<120x84xf32, #tpu.memory_space<vmem>>, %arg13: memref<1x84xf32, #tpu.memory_space<vmem>>, %arg14: memref<84x128xf32, #tpu.memory_space<vmem>>, %arg15: memref<1x128xf32, #tpu.memory_space<vmem>>, %arg16: memref<1x1x128xf32, #tpu.memory_space<vmem>>) attributes {dimension_semantics = [#tpu.dimension_semantics<parallel>], iteration_bounds = array<i64: 2>, scalar_prefetch = 0 : i64, scratch_operands = 0 : i64, tpu.core_type = #tpu.core_type<tc>, window_params = [{transform_indices = @transform_0, window_bounds = array<i64: 1, 1, 32, 32>}, {pipeline_mode = #tpu.pipeline_mode<synchronous>, transform_indices = @transform_1, window_bounds = array<i64: 5, 32, 168>}, {pipeline_mode = #tpu.pipeline_mode<synchronous>, transform_indices = @transform_2, window_bounds = array<i64: 1, 168>}, {pipeline_mode = #tpu.pipeline_mode<synchronous>, transform_indices = @transform_3, window_bounds = array<i64: 2, 14, 28>}, {pipeline_mode = #tpu.pipeline_mode<synchronous>, transform_indices = @transform_4, window_bounds = array<i64: 2, 168, 84>}, {pipeline_mode = #tpu.pipeline_mode<synchronous>, transform_indices = @transform_5, window_bounds = array<i64: 5, 84, 160>}, {pipeline_mode = #tpu.pipeline_mode<synchronous>, transform_indices = @transform_6, window_bounds = array<i64: 1, 160>}, {pipeline_mode = #tpu.pipeline_mode<synchronous>, transform_indices = @transform_7, window_bounds = array<i64: 2, 5, 10>}, {pipeline_mode = #tpu.pipeline_mode<synchronous>, transform_indices = @transform_8, window_bounds = array<i64: 2, 160, 80>}, {pipeline_mode = #tpu.pipeline_mode<synchronous>, transform_indices = @transform_9, window_bounds = array<i64: 5, 80, 120>}, {pipeline_mode = #tpu.pipeline_mode<synchronous>, transform_indices = @transform_10, window_bounds = array<i64: 1, 120>}, {pipeline_mode = #tpu.pipeline_mode<synchronous>, transform_indices = @transform_11, window_bounds = array<i64: 120, 84>}, {pipeline_mode = #tpu.pipeline_mode<synchronous>, transform_indices = @transform_12, window_bounds = array<i64: 1, 84>}, {pipeline_mode = #tpu.pipeline_mode<synchronous>, transform_indices = @transform_13, window_bounds = array<i64: 84, 128>}, {pipeline_mode = #tpu.pipeline_mode<synchronous>, transform_indices = @transform_14, window_bounds = array<i64: 1, 128>}, {transform_indices = @transform_15, window_bounds = array<i64: 1, 1, 128>}]} {
    %c0 = arith.constant 0 : index
    %c0_0 = arith.constant 0 : index
    %c0_1 = arith.constant 0 : index
    %c0_2 = arith.constant 0 : index
    %0 = vector.load %arg1[%c0, %c0_0, %c0_1, %c0_2] : memref<1x1x32x32xf32, #tpu.memory_space<vmem>>, vector<1x1x32x32xf32>
    %1 = vector.shape_cast %0 : vector<1x1x32x32xf32> to vector<32x32xf32>
    %cst = arith.constant 0.000000e+00 : f32
    %2 = vector.broadcast %cst : f32 to vector<28x168xf32>
    %3 = vector.extract_strided_slice %1 {offsets = [0, 0], sizes = [28, 32], strides = [1, 1]} : vector<32x32xf32> to vector<28x32xf32>
    %c0_3 = arith.constant 0 : index
    %c0_4 = arith.constant 0 : index
    %c0_5 = arith.constant 0 : index
    %4 = vector.load %arg2[%c0_3, %c0_4, %c0_5] : memref<5x32x168xf32, #tpu.memory_space<vmem>>, vector<1x32x168xf32>
    %5 = vector.shape_cast %4 : vector<1x32x168xf32> to vector<32x168xf32>
    %cst_6 = arith.constant dense<0.000000e+00> : vector<28x168xf32>
    %6 = tpu.matmul %3, %5, %cst_6 {dimension_numbers = #tpu.dot_dimension_numbers<[1], [0], [0], [1], [0, 0, 1, 1], [], []>} : vector<28x32xf32>, vector<32x168xf32>, vector<28x168xf32> -> vector<28x168xf32>
    %7 = arith.addf %2, %6 : vector<28x168xf32>
    %8 = vector.extract_strided_slice %1 {offsets = [1, 0], sizes = [28, 32], strides = [1, 1]} : vector<32x32xf32> to vector<28x32xf32>
    %c1 = arith.constant 1 : index
    %c0_7 = arith.constant 0 : index
    %c0_8 = arith.constant 0 : index
    %9 = vector.load %arg2[%c1, %c0_7, %c0_8] : memref<5x32x168xf32, #tpu.memory_space<vmem>>, vector<1x32x168xf32>
    %10 = vector.shape_cast %9 : vector<1x32x168xf32> to vector<32x168xf32>
    %cst_9 = arith.constant dense<0.000000e+00> : vector<28x168xf32>
    %11 = tpu.matmul %8, %10, %cst_9 {dimension_numbers = #tpu.dot_dimension_numbers<[1], [0], [0], [1], [0, 0, 1, 1], [], []>} : vector<28x32xf32>, vector<32x168xf32>, vector<28x168xf32> -> vector<28x168xf32>
    %12 = arith.addf %7, %11 : vector<28x168xf32>
    %13 = vector.extract_strided_slice %1 {offsets = [2, 0], sizes = [28, 32], strides = [1, 1]} : vector<32x32xf32> to vector<28x32xf32>
    %c2 = arith.constant 2 : index
    %c0_10 = arith.constant 0 : index
    %c0_11 = arith.constant 0 : index
    %14 = vector.load %arg2[%c2, %c0_10, %c0_11] : memref<5x32x168xf32, #tpu.memory_space<vmem>>, vector<1x32x168xf32>
    %15 = vector.shape_cast %14 : vector<1x32x168xf32> to vector<32x168xf32>
    %cst_12 = arith.constant dense<0.000000e+00> : vector<28x168xf32>
    %16 = tpu.matmul %13, %15, %cst_12 {dimension_numbers = #tpu.dot_dimension_numbers<[1], [0], [0], [1], [0, 0, 1, 1], [], []>} : vector<28x32xf32>, vector<32x168xf32>, vector<28x168xf32> -> vector<28x168xf32>
    %17 = arith.addf %12, %16 : vector<28x168xf32>
    %18 = vector.extract_strided_slice %1 {offsets = [3, 0], sizes = [28, 32], strides = [1, 1]} : vector<32x32xf32> to vector<28x32xf32>
    %c3 = arith.constant 3 : index
    %c0_13 = arith.constant 0 : index
    %c0_14 = arith.constant 0 : index
    %19 = vector.load %arg2[%c3, %c0_13, %c0_14] : memref<5x32x168xf32, #tpu.memory_space<vmem>>, vector<1x32x168xf32>
    %20 = vector.shape_cast %19 : vector<1x32x168xf32> to vector<32x168xf32>
    %cst_15 = arith.constant dense<0.000000e+00> : vector<28x168xf32>
    %21 = tpu.matmul %18, %20, %cst_15 {dimension_numbers = #tpu.dot_dimension_numbers<[1], [0], [0], [1], [0, 0, 1, 1], [], []>} : vector<28x32xf32>, vector<32x168xf32>, vector<28x168xf32> -> vector<28x168xf32>
    %22 = arith.addf %17, %21 : vector<28x168xf32>
    %23 = vector.extract_strided_slice %1 {offsets = [4, 0], sizes = [28, 32], strides = [1, 1]} : vector<32x32xf32> to vector<28x32xf32>
    %c4 = arith.constant 4 : index
    %c0_16 = arith.constant 0 : index
    %c0_17 = arith.constant 0 : index
    %24 = vector.load %arg2[%c4, %c0_16, %c0_17] : memref<5x32x168xf32, #tpu.memory_space<vmem>>, vector<1x32x168xf32>
    %25 = vector.shape_cast %24 : vector<1x32x168xf32> to vector<32x168xf32>
    %cst_18 = arith.constant dense<0.000000e+00> : vector<28x168xf32>
    %26 = tpu.matmul %23, %25, %cst_18 {dimension_numbers = #tpu.dot_dimension_numbers<[1], [0], [0], [1], [0, 0, 1, 1], [], []>} : vector<28x32xf32>, vector<32x168xf32>, vector<28x168xf32> -> vector<28x168xf32>
    %27 = arith.addf %22, %26 : vector<28x168xf32>
    %c0_19 = arith.constant 0 : index
    %c0_20 = arith.constant 0 : index
    %28 = vector.load %arg3[%c0_19, %c0_20] : memref<1x168xf32, #tpu.memory_space<vmem>>, vector<1x168xf32>
    %29 = vector.broadcast %28 : vector<1x168xf32> to vector<28x168xf32>
    %30 = arith.addf %27, %29 : vector<28x168xf32>
    %cst_21 = arith.constant 0.000000e+00 : f32
    %31 = vector.broadcast %cst_21 : f32 to vector<28x168xf32>
    %32 = arith.maximumf %30, %31 : vector<28x168xf32>
    %c0_22 = arith.constant 0 : index
    %c0_23 = arith.constant 0 : index
    %c0_24 = arith.constant 0 : index
    %33 = vector.load %arg4[%c0_22, %c0_23, %c0_24] : memref<2x14x28xf32, #tpu.memory_space<vmem>>, vector<1x14x28xf32>
    %34 = vector.shape_cast %33 : vector<1x14x28xf32> to vector<14x28xf32>
    %cst_25 = arith.constant dense<0.000000e+00> : vector<14x168xf32>
    %35 = tpu.matmul %34, %32, %cst_25 {dimension_numbers = #tpu.dot_dimension_numbers<[1], [0], [0], [1], [0, 0, 1, 1], [], []>} : vector<14x28xf32>, vector<28x168xf32>, vector<14x168xf32> -> vector<14x168xf32>
    %c1_26 = arith.constant 1 : index
    %c0_27 = arith.constant 0 : index
    %c0_28 = arith.constant 0 : index
    %36 = vector.load %arg4[%c1_26, %c0_27, %c0_28] : memref<2x14x28xf32, #tpu.memory_space<vmem>>, vector<1x14x28xf32>
    %37 = vector.shape_cast %36 : vector<1x14x28xf32> to vector<14x28xf32>
    %cst_29 = arith.constant dense<0.000000e+00> : vector<14x168xf32>
    %38 = tpu.matmul %37, %32, %cst_29 {dimension_numbers = #tpu.dot_dimension_numbers<[1], [0], [0], [1], [0, 0, 1, 1], [], []>} : vector<14x28xf32>, vector<28x168xf32>, vector<14x168xf32> -> vector<14x168xf32>
    %39 = arith.maximumf %35, %38 : vector<14x168xf32>
    %c0_30 = arith.constant 0 : index
    %c0_31 = arith.constant 0 : index
    %c0_32 = arith.constant 0 : index
    %40 = vector.load %arg5[%c0_30, %c0_31, %c0_32] : memref<2x168x84xf32, #tpu.memory_space<vmem>>, vector<1x168x84xf32>
    %41 = vector.shape_cast %40 : vector<1x168x84xf32> to vector<168x84xf32>
    %cst_33 = arith.constant dense<0.000000e+00> : vector<14x84xf32>
    %42 = tpu.matmul %39, %41, %cst_33 {dimension_numbers = #tpu.dot_dimension_numbers<[1], [0], [0], [1], [0, 0, 1, 1], [], []>} : vector<14x168xf32>, vector<168x84xf32>, vector<14x84xf32> -> vector<14x84xf32>
    %c1_34 = arith.constant 1 : index
    %c0_35 = arith.constant 0 : index
    %c0_36 = arith.constant 0 : index
    %43 = vector.load %arg5[%c1_34, %c0_35, %c0_36] : memref<2x168x84xf32, #tpu.memory_space<vmem>>, vector<1x168x84xf32>
    %44 = vector.shape_cast %43 : vector<1x168x84xf32> to vector<168x84xf32>
    %cst_37 = arith.constant dense<0.000000e+00> : vector<14x84xf32>
    %45 = tpu.matmul %39, %44, %cst_37 {dimension_numbers = #tpu.dot_dimension_numbers<[1], [0], [0], [1], [0, 0, 1, 1], [], []>} : vector<14x168xf32>, vector<168x84xf32>, vector<14x84xf32> -> vector<14x84xf32>
    %46 = arith.maximumf %42, %45 : vector<14x84xf32>
    %cst_38 = arith.constant 0.000000e+00 : f32
    %47 = vector.broadcast %cst_38 : f32 to vector<10x160xf32>
    %48 = vector.extract_strided_slice %46 {offsets = [0, 0], sizes = [10, 84], strides = [1, 1]} : vector<14x84xf32> to vector<10x84xf32>
    %c0_39 = arith.constant 0 : index
    %c0_40 = arith.constant 0 : index
    %c0_41 = arith.constant 0 : index
    %49 = vector.load %arg6[%c0_39, %c0_40, %c0_41] : memref<5x84x160xf32, #tpu.memory_space<vmem>>, vector<1x84x160xf32>
    %50 = vector.shape_cast %49 : vector<1x84x160xf32> to vector<84x160xf32>
    %cst_42 = arith.constant dense<0.000000e+00> : vector<10x160xf32>
    %51 = tpu.matmul %48, %50, %cst_42 {dimension_numbers = #tpu.dot_dimension_numbers<[1], [0], [0], [1], [0, 0, 1, 1], [], []>} : vector<10x84xf32>, vector<84x160xf32>, vector<10x160xf32> -> vector<10x160xf32>
    %52 = arith.addf %47, %51 : vector<10x160xf32>
    %53 = vector.extract_strided_slice %46 {offsets = [1, 0], sizes = [10, 84], strides = [1, 1]} : vector<14x84xf32> to vector<10x84xf32>
    %c1_43 = arith.constant 1 : index
    %c0_44 = arith.constant 0 : index
    %c0_45 = arith.constant 0 : index
    %54 = vector.load %arg6[%c1_43, %c0_44, %c0_45] : memref<5x84x160xf32, #tpu.memory_space<vmem>>, vector<1x84x160xf32>
    %55 = vector.shape_cast %54 : vector<1x84x160xf32> to vector<84x160xf32>
    %cst_46 = arith.constant dense<0.000000e+00> : vector<10x160xf32>
    %56 = tpu.matmul %53, %55, %cst_46 {dimension_numbers = #tpu.dot_dimension_numbers<[1], [0], [0], [1], [0, 0, 1, 1], [], []>} : vector<10x84xf32>, vector<84x160xf32>, vector<10x160xf32> -> vector<10x160xf32>
    %57 = arith.addf %52, %56 : vector<10x160xf32>
    %58 = vector.extract_strided_slice %46 {offsets = [2, 0], sizes = [10, 84], strides = [1, 1]} : vector<14x84xf32> to vector<10x84xf32>
    %c2_47 = arith.constant 2 : index
    %c0_48 = arith.constant 0 : index
    %c0_49 = arith.constant 0 : index
    %59 = vector.load %arg6[%c2_47, %c0_48, %c0_49] : memref<5x84x160xf32, #tpu.memory_space<vmem>>, vector<1x84x160xf32>
    %60 = vector.shape_cast %59 : vector<1x84x160xf32> to vector<84x160xf32>
    %cst_50 = arith.constant dense<0.000000e+00> : vector<10x160xf32>
    %61 = tpu.matmul %58, %60, %cst_50 {dimension_numbers = #tpu.dot_dimension_numbers<[1], [0], [0], [1], [0, 0, 1, 1], [], []>} : vector<10x84xf32>, vector<84x160xf32>, vector<10x160xf32> -> vector<10x160xf32>
    %62 = arith.addf %57, %61 : vector<10x160xf32>
    %63 = vector.extract_strided_slice %46 {offsets = [3, 0], sizes = [10, 84], strides = [1, 1]} : vector<14x84xf32> to vector<10x84xf32>
    %c3_51 = arith.constant 3 : index
    %c0_52 = arith.constant 0 : index
    %c0_53 = arith.constant 0 : index
    %64 = vector.load %arg6[%c3_51, %c0_52, %c0_53] : memref<5x84x160xf32, #tpu.memory_space<vmem>>, vector<1x84x160xf32>
    %65 = vector.shape_cast %64 : vector<1x84x160xf32> to vector<84x160xf32>
    %cst_54 = arith.constant dense<0.000000e+00> : vector<10x160xf32>
    %66 = tpu.matmul %63, %65, %cst_54 {dimension_numbers = #tpu.dot_dimension_numbers<[1], [0], [0], [1], [0, 0, 1, 1], [], []>} : vector<10x84xf32>, vector<84x160xf32>, vector<10x160xf32> -> vector<10x160xf32>
    %67 = arith.addf %62, %66 : vector<10x160xf32>
    %68 = vector.extract_strided_slice %46 {offsets = [4, 0], sizes = [10, 84], strides = [1, 1]} : vector<14x84xf32> to vector<10x84xf32>
    %c4_55 = arith.constant 4 : index
    %c0_56 = arith.constant 0 : index
    %c0_57 = arith.constant 0 : index
    %69 = vector.load %arg6[%c4_55, %c0_56, %c0_57] : memref<5x84x160xf32, #tpu.memory_space<vmem>>, vector<1x84x160xf32>
    %70 = vector.shape_cast %69 : vector<1x84x160xf32> to vector<84x160xf32>
    %cst_58 = arith.constant dense<0.000000e+00> : vector<10x160xf32>
    %71 = tpu.matmul %68, %70, %cst_58 {dimension_numbers = #tpu.dot_dimension_numbers<[1], [0], [0], [1], [0, 0, 1, 1], [], []>} : vector<10x84xf32>, vector<84x160xf32>, vector<10x160xf32> -> vector<10x160xf32>
    %72 = arith.addf %67, %71 : vector<10x160xf32>
    %c0_59 = arith.constant 0 : index
    %c0_60 = arith.constant 0 : index
    %73 = vector.load %arg7[%c0_59, %c0_60] : memref<1x160xf32, #tpu.memory_space<vmem>>, vector<1x160xf32>
    %74 = vector.broadcast %73 : vector<1x160xf32> to vector<10x160xf32>
    %75 = arith.addf %72, %74 : vector<10x160xf32>
    %cst_61 = arith.constant 0.000000e+00 : f32
    %76 = vector.broadcast %cst_61 : f32 to vector<10x160xf32>
    %77 = arith.maximumf %75, %76 : vector<10x160xf32>
    %c0_62 = arith.constant 0 : index
    %c0_63 = arith.constant 0 : index
    %c0_64 = arith.constant 0 : index
    %78 = vector.load %arg8[%c0_62, %c0_63, %c0_64] : memref<2x5x10xf32, #tpu.memory_space<vmem>>, vector<1x5x10xf32>
    %79 = vector.shape_cast %78 : vector<1x5x10xf32> to vector<5x10xf32>
    %cst_65 = arith.constant dense<0.000000e+00> : vector<5x160xf32>
    %80 = tpu.matmul %79, %77, %cst_65 {dimension_numbers = #tpu.dot_dimension_numbers<[1], [0], [0], [1], [0, 0, 1, 1], [], []>} : vector<5x10xf32>, vector<10x160xf32>, vector<5x160xf32> -> vector<5x160xf32>
    %c1_66 = arith.constant 1 : index
    %c0_67 = arith.constant 0 : index
    %c0_68 = arith.constant 0 : index
    %81 = vector.load %arg8[%c1_66, %c0_67, %c0_68] : memref<2x5x10xf32, #tpu.memory_space<vmem>>, vector<1x5x10xf32>
    %82 = vector.shape_cast %81 : vector<1x5x10xf32> to vector<5x10xf32>
    %cst_69 = arith.constant dense<0.000000e+00> : vector<5x160xf32>
    %83 = tpu.matmul %82, %77, %cst_69 {dimension_numbers = #tpu.dot_dimension_numbers<[1], [0], [0], [1], [0, 0, 1, 1], [], []>} : vector<5x10xf32>, vector<10x160xf32>, vector<5x160xf32> -> vector<5x160xf32>
    %84 = arith.maximumf %80, %83 : vector<5x160xf32>
    %c0_70 = arith.constant 0 : index
    %c0_71 = arith.constant 0 : index
    %c0_72 = arith.constant 0 : index
    %85 = vector.load %arg9[%c0_70, %c0_71, %c0_72] : memref<2x160x80xf32, #tpu.memory_space<vmem>>, vector<1x160x80xf32>
    %86 = vector.shape_cast %85 : vector<1x160x80xf32> to vector<160x80xf32>
    %cst_73 = arith.constant dense<0.000000e+00> : vector<5x80xf32>
    %87 = tpu.matmul %84, %86, %cst_73 {dimension_numbers = #tpu.dot_dimension_numbers<[1], [0], [0], [1], [0, 0, 1, 1], [], []>} : vector<5x160xf32>, vector<160x80xf32>, vector<5x80xf32> -> vector<5x80xf32>
    %c1_74 = arith.constant 1 : index
    %c0_75 = arith.constant 0 : index
    %c0_76 = arith.constant 0 : index
    %88 = vector.load %arg9[%c1_74, %c0_75, %c0_76] : memref<2x160x80xf32, #tpu.memory_space<vmem>>, vector<1x160x80xf32>
    %89 = vector.shape_cast %88 : vector<1x160x80xf32> to vector<160x80xf32>
    %cst_77 = arith.constant dense<0.000000e+00> : vector<5x80xf32>
    %90 = tpu.matmul %84, %89, %cst_77 {dimension_numbers = #tpu.dot_dimension_numbers<[1], [0], [0], [1], [0, 0, 1, 1], [], []>} : vector<5x160xf32>, vector<160x80xf32>, vector<5x80xf32> -> vector<5x80xf32>
    %91 = arith.maximumf %87, %90 : vector<5x80xf32>
    %92 = vector.extract_strided_slice %91 {offsets = [0, 0], sizes = [1, 80], strides = [1, 1]} : vector<5x80xf32> to vector<1x80xf32>
    %c0_78 = arith.constant 0 : index
    %c0_79 = arith.constant 0 : index
    %c0_80 = arith.constant 0 : index
    %93 = vector.load %arg10[%c0_78, %c0_79, %c0_80] : memref<5x80x120xf32, #tpu.memory_space<vmem>>, vector<1x80x120xf32>
    %94 = vector.shape_cast %93 : vector<1x80x120xf32> to vector<80x120xf32>
    %cst_81 = arith.constant dense<0.000000e+00> : vector<1x120xf32>
    %95 = tpu.matmul %92, %94, %cst_81 {dimension_numbers = #tpu.dot_dimension_numbers<[1], [0], [0], [1], [0, 0, 1, 1], [], []>} : vector<1x80xf32>, vector<80x120xf32>, vector<1x120xf32> -> vector<1x120xf32>
    %96 = vector.extract_strided_slice %91 {offsets = [1, 0], sizes = [1, 80], strides = [1, 1]} : vector<5x80xf32> to vector<1x80xf32>
    %c1_82 = arith.constant 1 : index
    %c0_83 = arith.constant 0 : index
    %c0_84 = arith.constant 0 : index
    %97 = vector.load %arg10[%c1_82, %c0_83, %c0_84] : memref<5x80x120xf32, #tpu.memory_space<vmem>>, vector<1x80x120xf32>
    %98 = vector.shape_cast %97 : vector<1x80x120xf32> to vector<80x120xf32>
    %cst_85 = arith.constant dense<0.000000e+00> : vector<1x120xf32>
    %99 = tpu.matmul %96, %98, %cst_85 {dimension_numbers = #tpu.dot_dimension_numbers<[1], [0], [0], [1], [0, 0, 1, 1], [], []>} : vector<1x80xf32>, vector<80x120xf32>, vector<1x120xf32> -> vector<1x120xf32>
    %100 = arith.addf %95, %99 : vector<1x120xf32>
    %101 = vector.extract_strided_slice %91 {offsets = [2, 0], sizes = [1, 80], strides = [1, 1]} : vector<5x80xf32> to vector<1x80xf32>
    %c2_86 = arith.constant 2 : index
    %c0_87 = arith.constant 0 : index
    %c0_88 = arith.constant 0 : index
    %102 = vector.load %arg10[%c2_86, %c0_87, %c0_88] : memref<5x80x120xf32, #tpu.memory_space<vmem>>, vector<1x80x120xf32>
    %103 = vector.shape_cast %102 : vector<1x80x120xf32> to vector<80x120xf32>
    %cst_89 = arith.constant dense<0.000000e+00> : vector<1x120xf32>
    %104 = tpu.matmul %101, %103, %cst_89 {dimension_numbers = #tpu.dot_dimension_numbers<[1], [0], [0], [1], [0, 0, 1, 1], [], []>} : vector<1x80xf32>, vector<80x120xf32>, vector<1x120xf32> -> vector<1x120xf32>
    %105 = arith.addf %100, %104 : vector<1x120xf32>
    %106 = vector.extract_strided_slice %91 {offsets = [3, 0], sizes = [1, 80], strides = [1, 1]} : vector<5x80xf32> to vector<1x80xf32>
    %c3_90 = arith.constant 3 : index
    %c0_91 = arith.constant 0 : index
    %c0_92 = arith.constant 0 : index
    %107 = vector.load %arg10[%c3_90, %c0_91, %c0_92] : memref<5x80x120xf32, #tpu.memory_space<vmem>>, vector<1x80x120xf32>
    %108 = vector.shape_cast %107 : vector<1x80x120xf32> to vector<80x120xf32>
    %cst_93 = arith.constant dense<0.000000e+00> : vector<1x120xf32>
    %109 = tpu.matmul %106, %108, %cst_93 {dimension_numbers = #tpu.dot_dimension_numbers<[1], [0], [0], [1], [0, 0, 1, 1], [], []>} : vector<1x80xf32>, vector<80x120xf32>, vector<1x120xf32> -> vector<1x120xf32>
    %110 = arith.addf %105, %109 : vector<1x120xf32>
    %111 = vector.extract_strided_slice %91 {offsets = [4, 0], sizes = [1, 80], strides = [1, 1]} : vector<5x80xf32> to vector<1x80xf32>
    %c4_94 = arith.constant 4 : index
    %c0_95 = arith.constant 0 : index
    %c0_96 = arith.constant 0 : index
    %112 = vector.load %arg10[%c4_94, %c0_95, %c0_96] : memref<5x80x120xf32, #tpu.memory_space<vmem>>, vector<1x80x120xf32>
    %113 = vector.shape_cast %112 : vector<1x80x120xf32> to vector<80x120xf32>
    %cst_97 = arith.constant dense<0.000000e+00> : vector<1x120xf32>
    %114 = tpu.matmul %111, %113, %cst_97 {dimension_numbers = #tpu.dot_dimension_numbers<[1], [0], [0], [1], [0, 0, 1, 1], [], []>} : vector<1x80xf32>, vector<80x120xf32>, vector<1x120xf32> -> vector<1x120xf32>
    %115 = arith.addf %110, %114 : vector<1x120xf32>
    %c0_98 = arith.constant 0 : index
    %c0_99 = arith.constant 0 : index
    %116 = vector.load %arg11[%c0_98, %c0_99] : memref<1x120xf32, #tpu.memory_space<vmem>>, vector<1x120xf32>
    %117 = arith.addf %115, %116 : vector<1x120xf32>
    %cst_100 = arith.constant 0.000000e+00 : f32
    %118 = vector.broadcast %cst_100 : f32 to vector<1x120xf32>
    %119 = arith.maximumf %117, %118 : vector<1x120xf32>
    %c0_101 = arith.constant 0 : index
    %c0_102 = arith.constant 0 : index
    %120 = vector.load %arg12[%c0_101, %c0_102] : memref<120x84xf32, #tpu.memory_space<vmem>>, vector<120x84xf32>
    %cst_103 = arith.constant dense<0.000000e+00> : vector<1x84xf32>
    %121 = tpu.matmul %119, %120, %cst_103 {dimension_numbers = #tpu.dot_dimension_numbers<[1], [0], [0], [1], [0, 0, 1, 1], [], []>} : vector<1x120xf32>, vector<120x84xf32>, vector<1x84xf32> -> vector<1x84xf32>
    %c0_104 = arith.constant 0 : index
    %c0_105 = arith.constant 0 : index
    %122 = vector.load %arg13[%c0_104, %c0_105] : memref<1x84xf32, #tpu.memory_space<vmem>>, vector<1x84xf32>
    %123 = arith.addf %121, %122 : vector<1x84xf32>
    %cst_106 = arith.constant 0.000000e+00 : f32
    %124 = vector.broadcast %cst_106 : f32 to vector<1x84xf32>
    %125 = arith.maximumf %123, %124 : vector<1x84xf32>
    %c0_107 = arith.constant 0 : index
    %c0_108 = arith.constant 0 : index
    %126 = vector.load %arg14[%c0_107, %c0_108] : memref<84x128xf32, #tpu.memory_space<vmem>>, vector<84x128xf32>
    %cst_109 = arith.constant dense<0.000000e+00> : vector<1x128xf32>
    %127 = tpu.matmul %125, %126, %cst_109 {dimension_numbers = #tpu.dot_dimension_numbers<[1], [0], [0], [1], [0, 0, 1, 1], [], []>} : vector<1x84xf32>, vector<84x128xf32>, vector<1x128xf32> -> vector<1x128xf32>
    %c0_110 = arith.constant 0 : index
    %c0_111 = arith.constant 0 : index
    %128 = vector.load %arg15[%c0_110, %c0_111] : memref<1x128xf32, #tpu.memory_space<vmem>>, vector<1x128xf32>
    %129 = arith.addf %127, %128 : vector<1x128xf32>
    %c0_112 = arith.constant 0 : index
    %c0_113 = arith.constant 0 : index
    %c0_114 = arith.constant 0 : index
    %130 = vector.load %arg16[%c0_112, %c0_113, %c0_114] : memref<1x1x128xf32, #tpu.memory_space<vmem>>, vector<1x1x128xf32>
    %131 = vector.shape_cast %130 : vector<1x1x128xf32> to vector<1x128xf32>
    %132 = vector.shape_cast %129 : vector<1x128xf32> to vector<1x1x128xf32>
    tpu.vector_store %arg16[%c0_112, %c0_113, %c0_114], %132 {strides = array<i32>} : memref<1x1x128xf32, #tpu.memory_space<vmem>>, vector<1x1x128xf32>,
    return
  }
  func.func @transform_0(%arg0: i32) -> (i32, i32, i32, i32) {
    %c0_i32 = arith.constant 0 : i32
    %c0_i32_0 = arith.constant 0 : i32
    %c0_i32_1 = arith.constant 0 : i32
    %c0_i32_2 = arith.constant 0 : i32
    return %arg0, %c0_i32, %c0_i32_0, %c0_i32_1 : i32, i32, i32, i32
  }
  func.func @transform_1(%arg0: i32) -> (i32, i32, i32) {
    %c0_i32 = arith.constant 0 : i32
    %c0_i32_0 = arith.constant 0 : i32
    %c0_i32_1 = arith.constant 0 : i32
    %c0_i32_2 = arith.constant 0 : i32
    return %c0_i32, %c0_i32_0, %c0_i32_1 : i32, i32, i32
  }
  func.func @transform_2(%arg0: i32) -> (i32, i32) {
    %c0_i32 = arith.constant 0 : i32
    %c0_i32_0 = arith.constant 0 : i32
    %c0_i32_1 = arith.constant 0 : i32
    return %c0_i32, %c0_i32_0 : i32, i32
  }
  func.func @transform_3(%arg0: i32) -> (i32, i32, i32) {
    %c0_i32 = arith.constant 0 : i32
    %c0_i32_0 = arith.constant 0 : i32
    %c0_i32_1 = arith.constant 0 : i32
    %c0_i32_2 = arith.constant 0 : i32
    return %c0_i32, %c0_i32_0, %c0_i32_1 : i32, i32, i32
  }
  func.func @transform_4(%arg0: i32) -> (i32, i32, i32) {
    %c0_i32 = arith.constant 0 : i32
    %c0_i32_0 = arith.constant 0 : i32
    %c0_i32_1 = arith.constant 0 : i32
    %c0_i32_2 = arith.constant 0 : i32
    return %c0_i32, %c0_i32_0, %c0_i32_1 : i32, i32, i32
  }
  func.func @transform_5(%arg0: i32) -> (i32, i32, i32) {
    %c0_i32 = arith.constant 0 : i32
    %c0_i32_0 = arith.constant 0 : i32
    %c0_i32_1 = arith.constant 0 : i32
    %c0_i32_2 = arith.constant 0 : i32
    return %c0_i32, %c0_i32_0, %c0_i32_1 : i32, i32, i32
  }
  func.func @transform_6(%arg0: i32) -> (i32, i32) {
    %c0_i32 = arith.constant 0 : i32
    %c0_i32_0 = arith.constant 0 : i32
    %c0_i32_1 = arith.constant 0 : i32
    return %c0_i32, %c0_i32_0 : i32, i32
  }
  func.func @transform_7(%arg0: i32) -> (i32, i32, i32) {
    %c0_i32 = arith.constant 0 : i32
    %c0_i32_0 = arith.constant 0 : i32
    %c0_i32_1 = arith.constant 0 : i32
    %c0_i32_2 = arith.constant 0 : i32
    return %c0_i32, %c0_i32_0, %c0_i32_1 : i32, i32, i32
  }
  func.func @transform_8(%arg0: i32) -> (i32, i32, i32) {
    %c0_i32 = arith.constant 0 : i32
    %c0_i32_0 = arith.constant 0 : i32
    %c0_i32_1 = arith.constant 0 : i32
    %c0_i32_2 = arith.constant 0 : i32
    return %c0_i32, %c0_i32_0, %c0_i32_1 : i32, i32, i32
  }
  func.func @transform_9(%arg0: i32) -> (i32, i32, i32) {
    %c0_i32 = arith.constant 0 : i32
    %c0_i32_0 = arith.constant 0 : i32
    %c0_i32_1 = arith.constant 0 : i32
    %c0_i32_2 = arith.constant 0 : i32
    return %c0_i32, %c0_i32_0, %c0_i32_1 : i32, i32, i32
  }
  func.func @transform_10(%arg0: i32) -> (i32, i32) {
    %c0_i32 = arith.constant 0 : i32
    %c0_i32_0 = arith.constant 0 : i32
    %c0_i32_1 = arith.constant 0 : i32
    return %c0_i32, %c0_i32_0 : i32, i32
  }
  func.func @transform_11(%arg0: i32) -> (i32, i32) {
    %c0_i32 = arith.constant 0 : i32
    %c0_i32_0 = arith.constant 0 : i32
    %c0_i32_1 = arith.constant 0 : i32
    return %c0_i32, %c0_i32_0 : i32, i32
  }
  func.func @transform_12(%arg0: i32) -> (i32, i32) {
    %c0_i32 = arith.constant 0 : i32
    %c0_i32_0 = arith.constant 0 : i32
    %c0_i32_1 = arith.constant 0 : i32
    return %c0_i32, %c0_i32_0 : i32, i32
  }
  func.func @transform_13(%arg0: i32) -> (i32, i32) {
    %c0_i32 = arith.constant 0 : i32
    %c0_i32_0 = arith.constant 0 : i32
    %c0_i32_1 = arith.constant 0 : i32
    return %c0_i32, %c0_i32_0 : i32, i32
  }
  func.func @transform_14(%arg0: i32) -> (i32, i32) {
    %c0_i32 = arith.constant 0 : i32
    %c0_i32_0 = arith.constant 0 : i32
    %c0_i32_1 = arith.constant 0 : i32
    return %c0_i32, %c0_i32_0 : i32, i32
  }
  func.func @transform_15(%arg0: i32) -> (i32, i32, i32) {
    %c0_i32 = arith.constant 0 : i32
    %c0_i32_0 = arith.constant 0 : i32
    %c0_i32_1 = arith.constant 0 : i32
    return %arg0, %c0_i32, %c0_i32_0 : i32, i32, i32
  }
}

</mosaic_0001>

<bundles_post_ra>
// kernel: lenet5_forward.1
= control target key start
LH: loop header
LB: loop body
LE: loop exit
PB: predicated region body
PF: predicated region fallthrough
CT: control target
= control target key end

     0   :  { %20 = vsyncpa [#allocation3], 0  ;;  %s5654_s0 = inlined_call_operand.vmem [shape: f32[2,1,32,32], index: 0, kind: input, shape index: {}]   ;;  %s5655_s1 = inlined_call_operand.vmem [shape: f32[5,32,168], index: 1, kind: input, shape index: {}]   ;;  %s5656_s2 = inlined_call_operand.vmem [shape: f32[1,168], index: 2, kind: input, shape index: {}]   ;;  %s5657_s3 = inlined_call_operand.vmem [shape: f32[2,14,28], index: 3, kind: input, shape index: {}]   ;;  %s5658_s4 = inlined_call_operand.vmem [shape: f32[2,168,84], index: 4, kind: input, shape index: {}]   ;;  %s5659_s5 = inlined_call_operand.vmem [shape: f32[5,84,160], index: 5, kind: input, shape index: {}]   ;;  %s5660_s6 = inlined_call_operand.vmem [shape: f32[1,160], index: 6, kind: input, shape index: {}]   ;;  %s5661_s7 = inlined_call_operand.vmem [shape: f32[2,5,10], index: 7, kind: input, shape index: {}]   ;;  %s5662_s8 = inlined_call_operand.vmem [shape: f32[2,160,80], index: 8, kind: input, shape index: {}]   ;;  %s5663_s9 = inlined_call_operand.vmem [shape: f32[5,80,120], index: 9, kind: input, shape index: {}]   ;;  %s5664_s10 = inlined_call_operand.vmem [shape: f32[1,120], index: 10, kind: input, shape index: {}]   ;;  %s5665_s11 = inlined_call_operand.vmem [shape: f32[120,84], index: 11, kind: input, shape index: {}]   ;;  %s5666_s12 = inlined_call_operand.vmem [shape: f32[1,84], index: 12, kind: input, shape index: {}]   ;;  %s5667_s13 = inlined_call_operand.vmem [shape: f32[84,128], index: 13, kind: input, shape index: {}]   ;;  %s5668_s14 = inlined_call_operand.vmem [shape: f32[1,128], index: 14, kind: input, shape index: {}]   ;;  %s5669_s15 = inlined_call_operand.hbm [shape: f32[2,1,128], index: 15, kind: output, shape index: {}]  }
   0x1   :  { %22 = vsyncpa [#allocation3 + $0x1], 0  ;;  %s4295_s18 = smov 0   ;;  %s4297_s19 = smov 0  }
   0x2   :  { %s4299_s20 = smov 0   ;;  %s4301_s21 = smov 0  }
   0x3 LB: > { %5676 = sst [smem:[#allocation5_spill]] %s4196_s18  ;;  %s4316_s22 = sadd.s32 4294967295, %s4208_s21   ;;  %s4208_s21 = sphi %s4301_s21, %s5687_s21   ;;  %s4204_s20 = sphi %s4299_s20, %s5689_s20   ;;  %s4200_s19 = sphi %s4297_s19, %s5691_s19   ;;  %s4196_s18 = sphi %s4295_s18, %s5690_s18  }
   0x4   : > { %5677 = sst [smem:[#allocation6_spill]] %s4204_s20  ;;  %s3114_s23 = sadd.s32 4294967294, %s4208_s21  }
   0x5   : > { %5678 = sst [smem:[#allocation7_spill]] %s4208_s21  ;;  %s4320_s24 = sadd.s32 1, %s4208_s21  }
   0x6   : > { %5679 = sst [smem:[#allocation8_spill]] %s4320_s24  ;;  %s355_s25 = sadd.s32 1, %s4204_s20 }
   0x7   : > { %s352_s26 = ssub.s32 %s4208_s21, %s4320_s24  ;;  %p365_p0 = scmp.ne.s32.totalorder %s4204_s20, %s4200_s19 }
   0x8   : > { %p353_p1 = scmp.eq.s32.totalorder %s352_s26, 0  ;;  %p366_p2 = scmp.eq.s32.totalorder %s4316_s22, 1 }
   0x9   : > { %p371_p3 = scmp.ne.s32.totalorder %s4200_s19, %s4196_s18  ;;  %p372_p4 = scmp.eq.s32.totalorder %s3114_s23, 1 }
   0xa   : > { %s4331_s27 = scalar_select %p353_p1, %s4204_s20, %s355_s25  }
   0xb   : > { %p4333_p5 = por %p366_p2, %p365_p0  ;;  %p4337_p6 = por %p372_p4, %p371_p3 }
   0xc   : > { %5680 = sst [smem:[#allocation9_spill]] %s4331_s27  ;;  %p3117_p7 = scmp.ge.s32.totalorder %s4208_s21, 1 }
   0xd   : > { %s5682_s29 = scalar_select %p4337_p6, 1, 0 }
   0xe   : > { %p440_p8 = scmp.lt.s32.totalorder %s4208_s21, 3 }
   0xf   : > { %5683 = sst [smem:[#allocation10_spill]] %s5682_s29 }
  0x10   : > { %p441_p9 = pnand %p3117_p7, %p440_p8 }
  0x11   : > { %v3121_v0 = vld [vmem:[%s5655_s1 + $0x48] sm:$0xff] (!%p441_p9)  ;;  %v3123_v1 = vld [vmem:[%s5655_s1 + $0x58] sm:$0xff] (!%p441_p9)  ;;  %v3120_v2 = vld [vmem:[%s5655_s1 + $0x40] sm:$0xff] (!%p441_p9)  ;;  %p487_p10 = scmp.lt.s32.totalorder (!%p441_p9), %s4316_s22, 1  ;;  %v4210_v7 = vmov (!%p441_p9), 0.0   ;;  %vm517_vm0 = vcmask (!%p441_p9), 1046528  }
  0x12   : > { %444 = sbr.rel (%p441_p9) target bundleno = 2312 (0x908), region = 80  ;;  %v3652_v3 = vpack.c.bf16 (!%p441_p9), %v3123_v1, %v3121_v0  ;;  %v3122_v4 = vld [vmem:[%s5655_s1 + $0x50] sm:$0xff] (!%p441_p9)  ;;  %v3125_v5 = vld [vmem:[%s5655_s1 + $0x68] sm:$0xff] (!%p441_p9)  ;;  %v3127_v6 = vld [vmem:[%s5655_s1 + $0x78] sm:$0xff] (!%p441_p9)  ;;  %598 = vmatprep.mubr.f32.mxu0 (!%p441_p9), %v4210_v7  ;;  %1193 = vmatprep.mubr.f32.mxu1 (!%p441_p9), %v4210_v7  ;;  %vm525_vm1 = vcmask (!%p441_p9), 261120   ;;  %vm973_vm2 = vcmask (!%p441_p9), 1043456  }
  0x13   : > { %v3654_v8 = vpack.c.bf16 (!%p441_p9), %v3122_v4, %v3120_v2  ;;  %v3656_v9 = vpack.c.bf16 (!%p441_p9), %v3127_v6, %v3125_v5  ;;  %v3124_v10 = vld [vmem:[%s5655_s1 + $0x60] sm:$0xff] (!%p441_p9)  ;;  %v3126_v11 = vld [vmem:[%s5655_s1 + $0x70] sm:$0xff] (!%p441_p9)  ;;  %v497_v12 = vld [vmem:[%s5655_s1 + $0x8] sm:$0xff] (!%p441_p9)  ;;  %vm729_vm3 = vcmask (!%p441_p9), 1045504   ;;  %vm851_vm4 = vcmask (!%p441_p9), 1044480  }
  0x14   : > { %3653 = vmatprep.subr.bf16.mxu0 (!%p441_p9), %v3652_v3  ;;  %v499_v13 = vld [vmem:[%s5655_s1 + $0x18] sm:$0xff] (!%p441_p9)  ;;  %v3658_v14 = vpack.c.bf16 (!%p441_p9), %v3126_v11, %v3124_v10  ;;  %v496_v15 = vld [vmem:[%s5655_s1] sm:$0xff] (!%p441_p9)  ;;  %v498_v17 = vld [vmem:[%s5655_s1 + $0x10] sm:$0xff] (!%p441_p9)  ;;  %vm4211_vm5 = vmmov (!%p441_p9), 1   ;;  %vm1116_vm7 = vcmask (!%p441_p9), 228352   ;;  %vm1317_vm8 = vcmask (!%p441_p9), 326656  }
  0x15   : > { %3655 = vmatpush1.bf16.msra.mxu0 (!%p441_p9), %v3654_v8  ;;  %v3660_v16 = vpack.c.bf16 (!%p441_p9), %v499_v13, %v497_v12  ;;  %v501_v18 = vld [vmem:[%s5655_s1 + $0x28] sm:$0xff] (!%p441_p9)  ;;  %v503_v19 = vld [vmem:[%s5655_s1 + $0x38] sm:$0xff] (!%p441_p9)  ;;  %v3662_v26 = vpack.c.bf16 (!%p441_p9), %v498_v17, %v496_v15  ;;  %v500_v30 = vld [vmem:[%s5655_s1 + $0x20] sm:$0xff] (!%p441_p9)  ;;  %vm1548_vm9 = vcmask (!%p441_p9), 687104   ;;  %vm2099_vm10 = vcmask (!%p441_p9), 1041408  }
  0x16   : > { %3657 = vmatprep.subr.bf16.mxu0 (!%p441_p9), %v3656_v9  ;;  %v3664_v29 = vpack.c.bf16 (!%p441_p9), %v503_v19, %v501_v18  ;;  %v502_v31 = vld [vmem:[%s5655_s1 + $0x30] sm:$0xff] (!%p441_p9)  ;;  %v3137_v32 = vld [vmem:[%s5655_s1 + $0x88] sm:$0xff] (!%p441_p9)  ;;  %v3139_v33 = vld [vmem:[%s5655_s1 + $0x98] sm:$0xff] (!%p441_p9)  ;;  %vm2095_vm12 = vcmask (!%p441_p9), 80896   ;;  %vm4213_vm13 = vmmov (!%p441_p9), 0   ;;  %vm2463_vm14 = vcmask (!%p441_p9), 654336  }
  0x17   : > { %v3666_v36 = vpack.c.bf16 (!%p441_p9), %v502_v31, %v500_v30  ;;  %v3668_v37 = vpack.c.bf16 (!%p441_p9), %v3139_v33, %v3137_v32  ;;  %v3136_v46 = vld [vmem:[%s5655_s1 + $0x80] sm:$0xff] (!%p441_p9)  ;;  %v3138_v47 = vld [vmem:[%s5655_s1 + $0x90] sm:$0xff] (!%p441_p9)  ;;  %v3141_v48 = vld [vmem:[%s5655_s1 + $0xa8] sm:$0xff] (!%p441_p9)  ;;  %v1088_v31 = vlaneseq (!%p441_p9)  ;;  %vm2882_vm15 = vcmask (!%p441_p9), 982016  }
  0x18   : > { %v3143_v49 = vld [vmem:[%s5655_s1 + $0xb8] sm:$0xff] (!%p441_p9)  ;;  %v3670_v50 = vpack.c.bf16 (!%p441_p9), %v3138_v47, %v3136_v46  ;;  %v3140_v52 = vld [vmem:[%s5655_s1 + $0xa0] sm:$0xff] (!%p441_p9)  ;;  %v3142_v53 = vld [vmem:[%s5655_s1 + $0xb0] sm:$0xff] (!%p441_p9) }
  0x19   : > { %s488_s24 = scalar_select %p487_p10, %s4316_s22, 1  ;;  %3659 = vmatpush1.bf16.msra.mxu0 %v3658_v14  ;;  %v3672_v51 = vpack.c.bf16 %v3143_v49, %v3141_v48  ;;  %v3149_v54 = vld [vmem:[%s5655_s1 + $0xc8] sm:$0xff]  ;;  %v3151_v55 = vld [vmem:[%s5655_s1 + $0xd8] sm:$0xff]  ;;  %v3674_v56 = vpack.c.bf16 %v3142_v53, %v3140_v52  ;;  %v3148_v60 = vld [vmem:[%s5655_s1 + $0xc0] sm:$0xff]  ;;  %v4563_v32 = vshrl.u32 %v1088_v31, 7 }
  0x1a   : > { %3661 = vmatprep.subr.bf16.mxu0 %v3660_v16  ;;  %v3676_v57 = vpack.c.bf16 %v3151_v55, %v3149_v54  ;;  %v3150_v61 = vld [vmem:[%s5655_s1 + $0xd0] sm:$0xff]  ;;  %v3153_v62 = vld [vmem:[%s5655_s1 + $0xe8] sm:$0xff]  ;;  %v3155_v63 = vld [vmem:[%s5655_s1 + $0xf8] sm:$0xff] }
  0x1b   : > { %s3395_s16 = sshll.u32 %s488_s24, 5  ;;  %v3678_v2 = vpack.c.bf16 %v3150_v61, %v3148_v60  ;;  %v3680_v3 = vpack.c.bf16 %v3155_v63, %v3153_v62  ;;  %v3152_v4 = vld [vmem:[%s5655_s1 + $0xe0] sm:$0xff]  ;;  %v3154_v5 = vld [vmem:[%s5655_s1 + $0xf0] sm:$0xff]  ;;  %v3161_v6 = vld [vmem:[%s5655_s1 + $0x108] sm:$0xff]  ;;  %v1090_v33 = vsub.s32 0, %v4563_v32  ;;  %s3392_s24 = sshll.u32 %s4316_s22, 4 }
  0x1c   : > { %s491_s27 = scalar_lea.vmem %s5654_s0, %s3395_s16  ;;  %v3163_v8 = vld [vmem:[%s5655_s1 + $0x118] sm:$0xff]  ;;  %v3682_v11 = vpack.c.bf16 %v3154_v5, %v3152_v4  ;;  %v3160_v16 = vld [vmem:[%s5655_s1 + $0x100] sm:$0xff]  ;;  %v3162_v17 = vld [vmem:[%s5655_s1 + $0x110] sm:$0xff]  ;;  %s5612_s23 = scalar_lea.hbm %s5669_s15, %s3392_s24 }
  0x1d   : > { %v4392_v20 = vld [vmem:[%s491_s27] sm:$0xff]  ;;  %v4394_v21 = vld [vmem:[%s491_s27 + $0x8] sm:$0xff]  ;;  %v4396_v22 = vld [vmem:[%s491_s27 + $0x10] sm:$0xff]  ;;  %v3684_v12 = vpack.c.bf16 %v3163_v8, %v3161_v6  ;;  %v4212_v8 = vmov 0.0|0.0   ;;  %s4214_s22 = smov [#allocation2]  }
  0x1e   : > { %v518_v23 = vrot.slane %v4392_v20, 1  ;;  %v519_v24 = vrot.slane %v4394_v21, 1  ;;  %v521_v25 = vrot.slane %v4396_v22, 1  ;;  %v4402_v28 = vld [vmem:[%s491_s27 + $0x18] sm:$0xff]  ;;  %v974_v38 = vrot.slane %v4392_v20, 4  ;;  %v3165_v18 = vld [vmem:[%s5655_s1 + $0x128] sm:$0xff]  ;;  %vm3697_vm6 = vmpackc.low %vm973_vm2, %vm4211_vm5 }
  0x1f   : > { %v523_v35 = vrot.slane %v4402_v28, 1  ;;  %v975_v39 = vrot.slane %v4394_v21, 4  ;;  %v977_v40 = vrot.slane %v4396_v22, 4  ;;  %v979_v42 = vrot.slane %v4402_v28, 4  ;;  %v3167_v19 = vld [vmem:[%s5655_s1 + $0x138] sm:$0xff]  ;;  %v1297_v4 = vld [vmem:[%s5658_s4 + $0x8] sm:$0xff]  ;;  %vm3873_vm11 = vmpackc.low %vm2099_vm10, %vm4211_vm5 }
  0x20   : > { %v520_v27 = vsel %vm517_vm0, %v518_v23, %v519_v24  ;;  %v522_v34 = vsel %vm517_vm0, %v519_v24, %v521_v25  ;;  %v730_v58 = vrot.slane %v4392_v20, 2  ;;  %v731_v59 = vrot.slane %v4394_v21, 2  ;;  %v3176_v5 = vld [vmem:[%s5657_s3 + $0x10] sm:$0xff]  ;;  %s485_s27 = sand.u32 1, %s4200_s19   ;;  %s4150_s25 = sshll.u32 %s4214_s22, 4  ;;  %s4151_s25 = int_to_ptr.vmem [resolvable:$false] %s4150_s25 }
  0x21   : > { %3128 = vmatmul.mubr.msk.f32.vlgmr.msra.gmra.mrb[0].mxu0 %vm525_vm1, %v520_v27  ;;  %v524_v41 = vsel %vm517_vm0, %v521_v25, %v523_v35  ;;  %v4428_v43 = vsel %vm973_vm2, %v974_v38, %v975_v39  ;;  %v4431_v44 = vsel %vm973_vm2, %v975_v39, %v977_v40  ;;  %v4436_v45 = vsel %vm973_vm2, %v977_v40, %v979_v42  ;;  %v3164_v25 = vld [vmem:[%s5655_s1 + $0x120] sm:$0xff]  ;;  %s486_s18 = scalar_lea.vmem [#allocation2], %s485_s27  ;;  %s3047_s20 = scalar_lea.sflag [#allocation3], %s485_s27 }
  0x22   : > { %604 = vmatprep.mubr.f32.mxu0 %v4210_v7  ;;  %3663 = vmatpush1.bf16.msra.mxu0 %v3662_v26  ;;  %v732_v0 = vsel %vm729_vm3, %v730_v58, %v731_v59  ;;  %v733_v1 = vrot.slane %v4396_v22, 2  ;;  %v735_v10 = vrot.slane %v4402_v28, 2  ;;  %v852_v14 = vrot.slane %v4392_v20, 3  ;;  %v3166_v26 = vld [vmem:[%s5655_s1 + $0x130] sm:$0xff]  ;;  %s3059_s21 = sshll.u32 %s486_s18, 4  ;;  %s4152_s26 = scalar_lea.vmem %s4151_s25, 32  ;;  %s5614_s21 = int_to_ptr.vmem [resolvable:$true] %s3059_s21 }
  0x23   : > { %3665 = vmatprep.subr.bf16.mxu0 %v3664_v29  ;;  %v853_v15 = vrot.slane %v4394_v21, 3  ;;  %v3686_v23 = vpack.c.bf16 %v3162_v17, %v3160_v16  ;;  %v3688_v24 = vpack.c.bf16 %v3167_v19, %v3165_v18  ;;  %v857_v29 = vrot.slane %v4402_v28, 3  ;;  %v1302_v16 = vld [vmem:[%s5658_s4 + $0x30] sm:$0xff]  ;;  %v1303_v17 = vld [vmem:[%s5658_s4 + $0x38] sm:$0xff]  ;;  %v1304_v19 = vld [vmem:[%s5658_s4 + $0x40] sm:$0xff]  ;;  %s4146_s29 = scalar_lea.vmem %s5614_s21, 16  ;;  %p4153_p0 = scmp.lt.s32.totalorder %s5614_s21, %s4151_s25 }
  0x24   : > { %v734_v9 = vsel %vm729_vm3, %v731_v59, %v733_v1  ;;  %v736_v13 = vsel %vm729_vm3, %v733_v1, %v735_v10  ;;  %v1114_v1 = vld [vmem:[%s5657_s3] sm:$0xff]  ;;  %v3722_v18 = vpack.c.bf16 %v1303_v17, %v1302_v16  ;;  %v3201_v16 = vld [vmem:[%s5658_s4 + $0x130] sm:$0xff]  ;;  %p4147_p11 = scmp.ne.s32.totalorder %s5614_s21, %s4146_s29  ;;  %p4154_p1 = scmp.lt.s32.totalorder %s4152_s26, %s4146_s29 }
  0x25   : > { %3129 = vmatmul.mubr.msk.f32.gmra.mrb[2].mxu0 %vm525_vm1, %v522_v34  ;;  %v1086_v34 = vld [vmem:[%s5656_s2] sm:$0x3] }
  0x26   : > { %610 = vmatprep.mubr.f32.mxu0 %v4210_v7  ;;  %3667 = vmatpush1.bf16.msra.mxu0 %v3666_v36  ;;  %v1091_v36 = vrot.slane %v1086_v34, %v1090_v33  ;;  %p4148_p12 = pnand %p4147_p11, %p4333_p5  ;;  %p4155_p2 = por %p4154_p1, %p4153_p0 }
  0x27   : > { %3669 = vmatprep.subr.bf16.mxu0 %v3668_v37 }
  0x28   : > { %p4149_p13 = pneg %p4148_p12 }
  0x29   : > { %3130 = vmatmul.mubr.msk.f32.gmra.mrb[4].mxu0 %vm525_vm1, %v524_v41 }
  0x2a   : > { %616 = vmatprep.mubr.f32.mxu0 %v4210_v7  ;;  %p4156_p3 = pnand %p4155_p2, %p4149_p13 }
  0x2d   : > { %3131 = vmatmul.mubr.msk.f32.gmra.mrb[6].mxu0 %vm525_vm1, %v523_v35  ;;  %v1094_v35 = vsub.s32 1, %v4563_v32  ;;  %v2094_v32 = vld [vmem:[%s5661_s7] sm:$0x1f] }
  0x2e   : > { %695 = vmatprep.mubr.f32.mxu0 %v4210_v7 }
  0x31   : > { %3132 = vmatmul.mubr.msk.f32.vlgmr.msra.gmra.mrb[0].mxu0 %vm525_vm1, %v4392_v20  ;;  %v854_v20 = vsel %vm851_vm4, %v852_v14, %v853_v15  ;;  %v1301_v14 = vld [vmem:[%s5658_s4 + $0x28] sm:$0xff] }
  0x32   : > { %701 = vmatprep.mubr.f32.mxu0 %v4210_v7  ;;  %3671 = vmatpush1.bf16.msra.mxu0 %v3670_v50 }
  0x33   : > { %3673 = vmatprep.subr.bf16.mxu0 %v3672_v51 }
  0x35   : > { %3133 = vmatmul.mubr.msk.f32.gmra.mrb[2].mxu0 %vm525_vm1, %v4394_v21  ;;  %v855_v21 = vrot.slane %v4396_v22, 3 }
  0x36   : > { %707 = vmatprep.mubr.f32.mxu0 %v4210_v7  ;;  %3675 = vmatpush1.bf16.msra.mxu0 %v3674_v56 }
  0x37   : > { %3677 = vmatprep.subr.bf16.mxu0 %v3676_v57  ;;  %v856_v27 = vsel %vm851_vm4, %v853_v15, %v855_v21  ;;  %v858_v30 = vsel %vm851_vm4, %v855_v21, %v857_v29 }
  0x39   : > { %3134 = vmatmul.mubr.msk.f32.gmra.mrb[4].mxu0 %vm525_vm1, %v4396_v22  ;;  %v3690_v22 = vpack.c.bf16 %v3166_v26, %v3164_v25  ;;  %v1308_v26 = vld [vmem:[%s5658_s4 + $0x60] sm:$0xff] }
  0x3a   : > { %713 = vmatprep.mubr.f32.mxu0 %v4210_v7 }
  0x3d   : > { %3135 = vmatmul.mubr.msk.f32.gmra.mrb[6].mxu0 %vm525_vm1, %v4402_v28  ;;  %v1095_v28 = vrot.slane %v1086_v34, %v1094_v35  ;;  %v1312_v34 = vld [vmem:[%s5658_s4 + $0x80] sm:$0xff] }
  0x3e   : > { %809 = vmatprep.mubr.f32.mxu0 %v4210_v7 }
  0x41   : > { %3144 = vmatmul.mubr.msk.f32.vlgmr.msra.gmra.mrb[0].mxu0 %vm525_vm1, %v732_v0 }
  0x42   : > { %815 = vmatprep.mubr.f32.mxu0 %v4210_v7  ;;  %3679 = vmatpush1.bf16.msra.mxu0 %v3678_v2  ;;  %v1115_v2 = vld [vmem:[%s5657_s3 + $0x8] sm:$0x3f] }
  0x43   : > { %3681 = vmatprep.subr.bf16.mxu0 %v3680_v3  ;;  %v1296_v3 = vld [vmem:[%s5658_s4] sm:$0xff] }
  0x44   : > { %v3713_v6 = vpack.c.bf16 %v1297_v4, %v1296_v3  ;;  %v3194_v4 = vld [vmem:[%s5658_s4 + $0xf8] sm:$0xff] }
  0x45   : > { %3145 = vmatmul.mubr.msk.f32.gmra.mrb[2].mxu0 %vm525_vm1, %v734_v9  ;;  %v1298_v9 = vld [vmem:[%s5658_s4 + $0x10] sm:$0xff] }
  0x46   : > { %821 = vmatprep.mubr.f32.mxu0 %v4210_v7  ;;  %3683 = vmatpush1.bf16.msra.mxu0 %v3682_v11  ;;  %v3177_v11 = vld [vmem:[%s5657_s3 + $0x18] sm:$0x3f] }
  0x47   : > { %3685 = vmatprep.subr.bf16.mxu0 %v3684_v12 }
  0x49   : > { %3146 = vmatmul.mubr.msk.f32.gmra.mrb[4].mxu0 %vm525_vm1, %v736_v13  ;;  %v1300_v13 = vld [vmem:[%s5658_s4 + $0x20] sm:$0xff] }
  0x4a   : > { %827 = vmatprep.mubr.f32.mxu0 %v4210_v7  ;;  %v3719_v15 = vpack.c.bf16 %v1301_v14, %v1300_v13  ;;  %v3199_v13 = vld [vmem:[%s5658_s4 + $0x120] sm:$0xff] }
  0x4d   : > { %3147 = vmatmul.mubr.msk.f32.gmra.mrb[6].mxu0 %vm525_vm1, %v735_v10  ;;  %v1299_v10 = vld [vmem:[%s5658_s4 + $0x18] sm:$0xff] }
  0x4e   : > { %931 = vmatprep.mubr.f32.mxu0 %v4210_v7  ;;  %v3716_v12 = vpack.c.bf16 %v1299_v10, %v1298_v9  ;;  %v3196_v9 = vld [vmem:[%s5658_s4 + $0x108] sm:$0xff]  ;;  %v3197_v10 = vld [vmem:[%s5658_s4 + $0x110] sm:$0xff] }
  0x51   : > { %3156 = vmatmul.mubr.msk.f32.vlgmr.msra.gmra.mrb[0].mxu0 %vm525_vm1, %v854_v20  ;;  %v1305_v20 = vld [vmem:[%s5658_s4 + $0x48] sm:$0xff] }
  0x52   : > { %937 = vmatprep.mubr.f32.mxu0 %v4210_v7  ;;  %3687 = vmatpush1.bf16.msra.mxu0 %v3686_v23  ;;  %v3725_v21 = vpack.c.bf16 %v1305_v20, %v1304_v19  ;;  %v1306_v23 = vld [vmem:[%s5658_s4 + $0x50] sm:$0xff]  ;;  %v3203_v19 = vld [vmem:[%s5658_s4 + $0x140] sm:$0xff] }
  0x53   : > { %3689 = vmatprep.subr.bf16.mxu0 %v3688_v24  ;;  %v1307_v24 = vld [vmem:[%s5658_s4 + $0x58] sm:$0xff] }
  0x54   : > { %v3728_v25 = vpack.c.bf16 %v1307_v24, %v1306_v23  ;;  %v3208_v23 = vld [vmem:[%s5659_s5 + $0xb8] sm:$0xff]  ;;  %v3210_v24 = vld [vmem:[%s5659_s5 + $0xc8] sm:$0xff] }
  0x55   : > { %3157 = vmatmul.mubr.msk.f32.gmra.mrb[2].mxu0 %vm525_vm1, %v856_v27  ;;  %v1309_v27 = vld [vmem:[%s5658_s4 + $0x68] sm:$0xff] }
  0x56   : > { %943 = vmatprep.mubr.f32.mxu0 %v4210_v7  ;;  %3691 = vmatpush1.bf16.msra.mxu0 %v3690_v22  ;;  %v1310_v22 = vld [vmem:[%s5658_s4 + $0x70] sm:$0xff] }
  0x59   : > { %3158 = vmatmul.mubr.msk.f32.gmra.mrb[4].mxu0 %vm525_vm1, %v858_v30  ;;  %v1311_v30 = vld [vmem:[%s5658_s4 + $0x78] sm:$0xff] }
  0x5a   : > { %949 = vmatprep.mubr.f32.mxu0 %v4210_v7  ;;  %v3734_v31 = vpack.c.bf16 %v1311_v30, %v1310_v22  ;;  %v3214_v22 = vld [vmem:[%s5659_s5 + $0xe8] sm:$0xff] }
  0x5d   : > { %3159 = vmatmul.mubr.msk.f32.gmra.mrb[6].mxu0 %vm525_vm1, %v857_v29  ;;  %v3731_v29 = vpack.c.bf16 %v1309_v27, %v1308_v26  ;;  %v3772_v26 = vpack.c.bf16 %v3210_v24, %v3208_v23  ;;  %v3209_v27 = vld [vmem:[%s5659_s5 + $0xc0] sm:$0xff]  ;;  %v1504_v24 = vld [vmem:[%s5659_s5 + $0x30] sm:$0xff] }
  0x5e   : > { %1053 = vmatprep.mubr.f32.mxu0 %v4210_v7  ;;  %v1502_v23 = vld [vmem:[%s5659_s5 + $0x20] sm:$0xff] }
  0x5f   : > { %3773 = vmatprep.subr.bf16.mxu0 %v3772_v26  ;;  %v1507_v26 = vld [vmem:[%s5659_s5 + $0x48] sm:$0xff] }
  0x61   : > { %3168 = vmatmul.mubr.msk.f32.vlgmr.msra.gmra.mrb[0].mxu0 %vm525_vm1, %v4428_v43 }
  0x62   : > { %1059 = vmatprep.mubr.f32.mxu0 %v4210_v7 }
  0x65   : > { %3169 = vmatmul.mubr.msk.f32.gmra.mrb[2].mxu0 %vm525_vm1, %v4431_v44 }
  0x66   : > { %1065 = vmatprep.mubr.f32.mxu0 %v4210_v7 }
  0x69   : > { %3170 = vmatmul.mubr.msk.f32.gmra.mrb[4].mxu0 %vm525_vm1, %v4436_v45 }
  0x6a   : > { %1071 = vmatprep.mubr.f32.mxu0 %v4210_v7 }
  0x6d   : > { %3171 = vmatmul.mubr.msk.f32.gmra.mrb[6].mxu0 %vm525_vm1, %v979_v42 }
  0x6e   : > { %1623 = vmatprep.mubr.f32.mxu0 %v4210_v7 }
 0x134   : > { %v1055_v37 = vpop.f32.mrb[0].mxu0 }
 0x135   : > { %v1057_v38 = vpop.f32.mrb[1].mxu0  ;;  %v1098_v39 = vadd.f32 %v1091_v36, %v1055_v37 }
 0x136   : > { %v1099_v40 = vadd.f32 %v1095_v28, %v1057_v38  ;;  %v1315_v38 = vld [vmem:[%s5658_s4 + $0x98] sm:$0xff] }
 0x137   : > { %v1106_v45 = vmax.f32 %v1098_v39, 0.0 }
 0x138   : > { %v1061_v41 = vpop.f32.mrb[2].mxu0  ;;  %v1107_v47 = vmax.f32 %v1099_v40, 0.0  ;;  %v1316_v40 = vld [vmem:[%s5658_s4 + $0xa0] sm:$0xff] }
 0x139   : > { %v1100_v42 = vadd.f32 %v1091_v36, %v1061_v41  ;;  %v1063_v43 = vpop.f32.mrb[3].mxu0 }
 0x13a   : > { %v1101_v44 = vadd.f32 %v1095_v28, %v1063_v43 }
 0x13b   : > { %v1108_v46 = vmax.f32 %v1100_v42, 0.0 }
 0x13c   : > { %v1109_v48 = vmax.f32 %v1101_v44, 0.0  ;;  %v1067_v49 = vpop.f32.mrb[4].mxu0 }
 0x13d   : > { %v1069_v50 = vpop.f32.mrb[5].mxu0  ;;  %v3694_v51 = vpack.c.bf16 %v1108_v46, %v1106_v45  ;;  %v1102_v53 = vadd.f32 %v1091_v36, %v1067_v49  ;;  %v3184_v45 = vld [vmem:[%s5658_s4 + $0xa8] sm:$0xff]  ;;  %v3185_v46 = vld [vmem:[%s5658_s4 + $0xb0] sm:$0xff] }
 0x13e   : > { %v3692_v52 = vpack.c.bf16 %v1109_v48, %v1107_v47  ;;  %v1103_v54 = vadd.f32 %v1095_v28, %v1069_v50 }
 0x13f   : > { %v1110_v59 = vmax.f32 %v1102_v53, 0.0  ;;  %v3187_v53 = vld [vmem:[%s5658_s4 + $0xc0] sm:$0xff] }
 0x140   : > { %v1073_v55 = vpop.f32.mrb[6].mxu0  ;;  %3693 = vmatprep.subr.bf16.mxu1 %v3692_v52  ;;  %v1111_v61 = vmax.f32 %v1103_v54, 0.0 }
 0x141   : > { %v1104_v56 = vadd.f32 %v1091_v36, %v1073_v55  ;;  %v1075_v57 = vpop.f32.mrb[7].mxu0  ;;  %3695 = vmatpush1.bf16.msra.mxu1 %v3694_v51  ;;  %v1313_v36 = vld [vmem:[%s5658_s4 + $0x88] sm:$0xff] }
 0x142   : > { %v1105_v58 = vadd.f32 %v1095_v28, %v1075_v57  ;;  %v3737_v37 = vpack.c.bf16 %v1313_v36, %v1312_v34  ;;  %v1314_v28 = vld [vmem:[%s5658_s4 + $0x90] sm:$0xff]  ;;  %v3213_v36 = vld [vmem:[%s5659_s5 + $0xe0] sm:$0xff] }
 0x143   : > { %v1112_v60 = vmax.f32 %v1104_v56, 0.0  ;;  %v3740_v39 = vpack.c.bf16 %v1315_v38, %v1314_v28  ;;  %v3211_v34 = vld [vmem:[%s5659_s5 + $0xd0] sm:$0xff]  ;;  %v3218_v28 = vld [vmem:[%s5659_s5 + $0x108] sm:$0xff] }
 0x144   : > { %v1113_v62 = vmax.f32 %v1105_v58, 0.0  ;;  %v3778_v38 = vpack.c.bf16 %v3213_v36, %v3211_v34  ;;  %v1506_v36 = vld [vmem:[%s5659_s5 + $0x40] sm:$0xff] }
 0x145   : > { %v3699_v63 = vpack.c.bf16 %v1112_v60, %v1110_v59  ;;  %v3188_v59 = vld [vmem:[%s5658_s4 + $0xc8] sm:$0xff]  ;;  %v3189_v60 = vld [vmem:[%s5658_s4 + $0xd0] sm:$0xff] }
 0x146   : > { %v3696_v0 = vpack.c.bf16 %v1113_v62, %v1111_v61  ;;  %v3749_v61 = vpack.c.bf16 %v3189_v60, %v3188_v59  ;;  %v3190_v62 = vld [vmem:[%s5658_s4 + $0xd8] sm:$0xff] }
 0x148   : > { %3698 = vmatprep.subr.msk.bf16.mxu1 %vm3697_vm6, %v3696_v0 }
 0x149   : > { %3701 = vmatpush1.bf16.msk.msra.mxu1 %vm3697_vm6, %v3699_v63 }
 0x14a   : > { %3703 = vmatprep.subr.bf16.mxu1 %v3692_v52  ;;  %v3186_v52 = vld [vmem:[%s5658_s4 + $0xb8] sm:$0xff] }
 0x14b   : > { %v3746_v58 = vpack.c.bf16 %v3187_v53, %v3186_v52  ;;  %v3223_v52 = vld [vmem:[%s5659_s5 + $0x130] sm:$0xff]  ;;  %v3225_v53 = vld [vmem:[%s5659_s5 + $0x140] sm:$0xff] }
 0x14c   : > { %3174 = vmatmul.mubr.msk.f32.vlgmr.msra.gmra.mrb[0].mxu1 %vm1116_vm7, %v1114_v1  ;;  %v3192_v1 = vld [vmem:[%s5658_s4 + $0xe8] sm:$0xff] }
 0x14d   : > { %3705 = vmatpush1.bf16.msra.mxu1 %v3694_v51  ;;  %1199 = vmatprep.mubr.f32.mxu1 %v4210_v7  ;;  %v3743_v51 = vpack.c.bf16 %v3185_v46, %v3184_v45  ;;  %v3219_v46 = vld [vmem:[%s5659_s5 + $0x110] sm:$0xff] }
 0x14e   : > { %3708 = vmatprep.subr.msk.bf16.mxu1 %vm3697_vm6, %v3696_v0 }
 0x150   : > { %3175 = vmatmul.mubr.msk.f32.gmra.mrb[2].mxu1 %vm1116_vm7, %v1115_v2  ;;  %v3193_v2 = vld [vmem:[%s5658_s4 + $0xf0] sm:$0xff] }
 0x151   : > { %3711 = vmatpush1.bf16.msk.msra.mxu1 %vm3697_vm6, %v3699_v63  ;;  %1279 = vmatprep.mubr.f32.mxu1 %v4210_v7  ;;  %v3191_v63 = vld [vmem:[%s5658_s4 + $0xe0] sm:$0xff]  ;;  %v3755_v3 = vpack.c.bf16 %v3193_v2, %v3192_v1 }
 0x152   : > { %3712 = vmatprep.subr.bf16.mxu1 %v4212_v8  ;;  %v3752_v0 = vpack.c.bf16 %v3191_v63, %v3190_v62 }
 0x154   : > { %3180 = vmatmul.mubr.msk.f32.vlgmr.msra.gmra.mrb[4].mxu1 %vm1116_vm7, %v3176_v5  ;;  %v3195_v5 = vld [vmem:[%s5658_s4 + $0x100] sm:$0xff] }
 0x155   : > { %1285 = vmatprep.mubr.f32.mxu1 %v4210_v7  ;;  %3714 = vmatpush1.bf16.msra.mxu1 %v3713_v6  ;;  %v3758_v6 = vpack.c.bf16 %v3195_v5, %v3194_v4  ;;  %v1500_v4 = vld [vmem:[%s5659_s5 + $0x10] sm:$0xff] }
 0x156   : > { %3715 = vmatprep.subr.bf16.mxu1 %v4212_v8 }
 0x158   : > { %3181 = vmatmul.mubr.msk.f32.gmra.mrb[6].mxu1 %vm1116_vm7, %v3177_v11  ;;  %v3761_v11 = vpack.c.bf16 %v3197_v10, %v3196_v9 }
 0x159   : > { %3717 = vmatpush1.bf16.msra.mxu1 %v3716_v12  ;;  %v3198_v12 = vld [vmem:[%s5658_s4 + $0x118] sm:$0xff] }
 0x15a   : > { %3718 = vmatprep.subr.bf16.mxu1 %v4212_v8  ;;  %v3764_v14 = vpack.c.bf16 %v3199_v13, %v3198_v12  ;;  %v1505_v12 = vld [vmem:[%s5659_s5 + $0x38] sm:$0xff] }
 0x15d   : > { %3720 = vmatpush1.bf16.msra.mxu1 %v3719_v15  ;;  %v3200_v15 = vld [vmem:[%s5658_s4 + $0x128] sm:$0xff] }
 0x15e   : > { %3721 = vmatprep.subr.bf16.mxu1 %v4212_v8  ;;  %v3767_v17 = vpack.c.bf16 %v3201_v16, %v3200_v15 }
 0x161   : > { %3723 = vmatpush1.bf16.msra.mxu1 %v3722_v18  ;;  %v3202_v18 = vld [vmem:[%s5658_s4 + $0x138] sm:$0xff] }
 0x162   : > { %3724 = vmatprep.subr.bf16.mxu1 %v4212_v8  ;;  %v3770_v20 = vpack.c.bf16 %v3203_v19, %v3202_v18 }
 0x165   : > { %3726 = vmatpush1.bf16.msra.mxu1 %v3725_v21  ;;  %v3204_v21 = vld [vmem:[%s5658_s4 + $0x148] sm:$0xff] }
 0x166   : > { %3727 = vmatprep.subr.bf16.mxu1 %v4212_v8 }
 0x169   : > { %3729 = vmatpush1.bf16.msra.mxu1 %v3728_v25  ;;  %v3207_v25 = vld [vmem:[%s5659_s5 + $0xb0] sm:$0xff] }
 0x16a   : > { %3730 = vmatprep.subr.bf16.mxu1 %v4212_v8  ;;  %v3774_v30 = vpack.c.bf16 %v3209_v27, %v3207_v25  ;;  %v1509_v27 = vld [vmem:[%s5659_s5 + $0x58] sm:$0xff] }
 0x16b   : > { %v3800_v34 = vpack.c.bf16 %v1509_v27, %v1507_v26  ;;  %v3264_v26 = vld [vmem:[%s5659_s5 + $0x218] sm:$0xff]  ;;  %v3266_v27 = vld [vmem:[%s5659_s5 + $0x228] sm:$0xff] }
 0x16c   : > { %3775 = vmatpush1.bf16.msra.mxu0 %v3774_v30 }
 0x16d   : > { %3732 = vmatpush1.bf16.msra.mxu1 %v3731_v29  ;;  %v3212_v29 = vld [vmem:[%s5659_s5 + $0xd8] sm:$0xff] }
 0x16e   : > { %3733 = vmatprep.subr.bf16.mxu1 %v4212_v8 }
 0x171   : > { %3735 = vmatpush1.bf16.msra.mxu1 %v3734_v31  ;;  %v3776_v31 = vpack.c.bf16 %v3214_v22, %v3212_v29 }
 0x172   : > { %3736 = vmatprep.subr.bf16.mxu1 %v4212_v8 }
 0x173   : > { %3777 = vmatprep.subr.bf16.mxu0 %v3776_v31  ;;  %v3798_v31 = vpack.c.bf16 %v1504_v24, %v1502_v23  ;;  %v3255_v23 = vld [vmem:[%s5659_s5 + $0x1f0] sm:$0xff] }
 0x174   : > { %3779 = vmatpush1.bf16.msra.mxu0 %v3778_v38  ;;  %v1513_v38 = vld [vmem:[%s5659_s5 + $0x78] sm:$0xff] }
 0x175   : > { %3738 = vmatpush1.bf16.msra.mxu1 %v3737_v37  ;;  %v3216_v37 = vld [vmem:[%s5659_s5 + $0xf8] sm:$0xff] }
 0x176   : > { %3739 = vmatprep.subr.bf16.mxu1 %v4212_v8 }
 0x179   : > { %3741 = vmatpush1.bf16.msra.mxu1 %v3740_v39  ;;  %v3780_v39 = vpack.c.bf16 %v3218_v28, %v3216_v37  ;;  %v1508_v37 = vld [vmem:[%s5659_s5 + $0x50] sm:$0xff]  ;;  %v1511_v28 = vld [vmem:[%s5659_s5 + $0x68] sm:$0xff] }
 0x17a   : > { %1364 = vmatprep.subr.mxu1 %v4210_v7 }
 0x17b   : > { %3781 = vmatprep.subr.bf16.mxu0 %v3780_v39  ;;  %v3802_v39 = vpack.c.bf16 %v1508_v37, %v1506_v36  ;;  %v3268_v36 = vld [vmem:[%s5659_s5 + $0x238] sm:$0xff]  ;;  %v3270_v37 = vld [vmem:[%s5659_s5 + $0x248] sm:$0xff] }
 0x17d   : > { %1365 = vmatpush1.msra.mxu1 %v1316_v40  ;;  %v3215_v40 = vld [vmem:[%s5659_s5 + $0xf0] sm:$0xff] }
 0x17e   : > { %3742 = vmatprep.subr.bf16.mxu1 %v4212_v8 }
 0x21f   : > { %v1195_v41 = vpop.f32.mrb[0].mxu1 }
 0x220   : > { %v1197_v42 = vpop.f32.mrb[1].mxu1 }
 0x223   : > { %v1201_v43 = vpop.f32.mrb[2].mxu1 }
 0x224   : > { %v1203_v44 = vpop.f32.mrb[3].mxu1 }
 0x227   : > { %v1281_v47 = vpop.f32.mrb[4].mxu1 }
 0x228   : > { %v1292_v48 = vmax.f32 %v1195_v41, %v1281_v47  ;;  %v1283_v49 = vpop.f32.mrb[5].mxu1  ;;  %v3217_v41 = vld [vmem:[%s5659_s5 + $0x100] sm:$0xff] }
 0x229   : > { %v1293_v50 = vmax.f32 %v1197_v42, %v1283_v49  ;;  %v3220_v42 = vld [vmem:[%s5659_s5 + $0x118] sm:$0xff]  ;;  %v3221_v47 = vld [vmem:[%s5659_s5 + $0x120] sm:$0xff] }
 0x22a   : > { %v3224_v49 = vld [vmem:[%s5659_s5 + $0x138] sm:$0xff] }
 0x22b   : > { %v1287_v54 = vpop.f32.mrb[6].mxu1  ;;  %3182 = vmatprep.mubr.msk.f32.mxu1 %vm1317_vm8, %v1293_v50 }
 0x22c   : > { %v1294_v55 = vmax.f32 %v1201_v43, %v1287_v54  ;;  %v1289_v56 = vpop.f32.mrb[7].mxu1  ;;  %1389 = vmatmul.mubr.f32.vlgmr.msra.gmra.mrb[8].mxu1 %v1292_v48  ;;  %v3222_v43 = vld [vmem:[%s5659_s5 + $0x128] sm:$0xff]  ;;  %v3790_v54 = vpack.c.bf16 %v3225_v53, %v3223_v52  ;;  %v3240_v52 = vld [vmem:[%s5659_s5 + $0x178] sm:$0xff]  ;;  %v3237_v53 = vld [vmem:[%s5659_s5 + $0x160] sm:$0xff] }
 0x22d   : > { %v1295_v57 = vmax.f32 %v1203_v44, %v1289_v56  ;;  %3744 = vmatpush1.bf16.msra.mxu1 %v3743_v51  ;;  %v3782_v44 = vpack.c.bf16 %v3217_v41, %v3215_v40  ;;  %v3784_v45 = vpack.c.bf16 %v3222_v43, %v3220_v42  ;;  %v3227_v56 = vld [vmem:[%s5659_s5 + $0x150] sm:$0xf]  ;;  %v3804_v40 = vpack.c.bf16 %v1513_v38, %v1511_v28  ;;  %v1510_v41 = vld [vmem:[%s5659_s5 + $0x60] sm:$0xff]  ;;  %v1515_v43 = vld [vmem:[%s5659_s5 + $0x88] sm:$0xff] }
 0x22e   : > { %3745 = vmatprep.subr.bf16.mxu1 %v4212_v8  ;;  %v1512_v42 = vld [vmem:[%s5659_s5 + $0x70] sm:$0xff]  ;;  %v3257_v28 = vld [vmem:[%s5659_s5 + $0x200] sm:$0xf]  ;;  %v3832_v38 = vpack.c.bf16 %v3266_v27, %v3264_v26  ;;  %v3306_v27 = vld [vmem:[%s5659_s5 + $0x348] sm:$0xff] }
 0x22f   : > { %3183 = vmatprep.mubr.msk.f32.mxu1 %vm1317_vm8, %v1295_v57  ;;  %3783 = vmatpush1.bf16.msra.mxu0 %v3782_v44  ;;  %v1517_v44 = vld [vmem:[%s5659_s5 + $0x98] sm:$0xff]  ;;  %v3303_v26 = vld [vmem:[%s5659_s5 + $0x330] sm:$0xff] }
 0x230   : > { %1394 = vmatmul.mubr.f32.gmra.mrb[10].mxu1 %v1294_v55  ;;  %3785 = vmatprep.subr.bf16.mxu0 %v3784_v45  ;;  %v3806_v45 = vpack.c.bf16 %v1512_v42, %v1510_v41  ;;  %v3267_v41 = vld [vmem:[%s5659_s5 + $0x230] sm:$0xff]  ;;  %v3269_v42 = vld [vmem:[%s5659_s5 + $0x240] sm:$0xff] }
 0x231   : > { %3747 = vmatpush1.bf16.msra.mxu1 %v3746_v58  ;;  %3205 = vmatprep.mubr.msk.f32.mxu1 %vm1317_vm8, %v1293_v50  ;;  %v3226_v50 = vld [vmem:[%s5659_s5 + $0x148] sm:$0xff]  ;;  %v1501_v58 = vld [vmem:[%s5659_s5 + $0x18] sm:$0xff] }
 0x232   : > { %3748 = vmatprep.subr.bf16.mxu1 %v4212_v8  ;;  %v3788_v51 = vpack.c.bf16 %v3226_v50, %v3224_v49  ;;  %v1519_v50 = vld [vmem:[%s5659_s5 + $0xa8] sm:$0xf] }
 0x235   : > { %3750 = vmatpush1.bf16.msra.mxu1 %v3749_v61 }
 0x236   : > { %3751 = vmatprep.subr.bf16.mxu1 %v4212_v8 }
 0x239   : > { %3753 = vmatpush1.bf16.msra.mxu1 %v3752_v0 }
 0x23a   : > { %3754 = vmatprep.subr.bf16.mxu1 %v4212_v8 }
 0x23d   : > { %3756 = vmatpush1.bf16.msra.mxu1 %v3755_v3  ;;  %v1498_v3 = vld [vmem:[%s5659_s5] sm:$0xff] }
 0x23e   : > { %3757 = vmatprep.subr.bf16.mxu1 %v4212_v8  ;;  %v3794_v10 = vpack.c.bf16 %v1500_v4, %v1498_v3  ;;  %v3245_v4 = vld [vmem:[%s5659_s5 + $0x1a0] sm:$0xff] }
 0x241   : > { %3759 = vmatpush1.bf16.msra.mxu1 %v3758_v6 }
 0x242   : > { %3760 = vmatprep.subr.bf16.mxu1 %v4212_v8 }
 0x245   : > { %3762 = vmatpush1.bf16.msra.mxu1 %v3761_v11  ;;  %v1503_v11 = vld [vmem:[%s5659_s5 + $0x28] sm:$0xff] }
 0x246   : > { %3763 = vmatprep.subr.bf16.mxu1 %v4212_v8 }
 0x249   : > { %3765 = vmatpush1.bf16.msra.mxu1 %v3764_v14 }
 0x24a   : > { %3766 = vmatprep.subr.bf16.mxu1 %v4212_v8 }
 0x24d   : > { %3768 = vmatpush1.bf16.msra.mxu1 %v3767_v17 }
 0x24e   : > { %3769 = vmatprep.subr.bf16.mxu1 %v4212_v8 }
 0x251   : > { %3771 = vmatpush1.bf16.msra.mxu1 %v3770_v20 }
 0x252   : > { %1461 = vmatprep.subr.mxu1 %v4210_v7 }
 0x255   : > { %1462 = vmatpush1.msra.mxu1 %v3204_v21  ;;  %v3796_v21 = vpack.c.bf16 %v1505_v12, %v1503_v11  ;;  %v3249_v12 = vld [vmem:[%s5659_s5 + $0x1c0] sm:$0xff] }
 0x256   : > { %1486 = vmatmul.mubr.f32.vlgmr.msra.gmra.mrb[12].mxu1 %v1292_v48  ;;  %v3786_v48 = vpack.c.bf16 %v3221_v47, %v3219_v46  ;;  %v3808_v46 = vpack.c.bf16 %v1517_v44, %v1515_v43  ;;  %v1514_v47 = vld [vmem:[%s5659_s5 + $0x80] sm:$0xff]  ;;  %v3272_v43 = vld [vmem:[%s5659_s5 + $0x258] sm:$0xff]  ;;  %v3274_v44 = vld [vmem:[%s5659_s5 + $0x268] sm:$0xff] }
 0x257   : > { %3206 = vmatprep.mubr.msk.f32.mxu1 %vm1317_vm8, %v1295_v57  ;;  %v1499_v57 = vld [vmem:[%s5659_s5 + $0x8] sm:$0xff] }
 0x258   : > { %3787 = vmatpush1.bf16.msra.mxu0 %v3786_v48  ;;  %v3792_v59 = vpack.c.bf16 %v1501_v58, %v1499_v57  ;;  %v1516_v48 = vld [vmem:[%s5659_s5 + $0x90] sm:$0xff]  ;;  %v1518_v57 = vld [vmem:[%s5659_s5 + $0xa0] sm:$0xf] }
 0x259   : > { %3789 = vmatprep.subr.bf16.mxu0 %v3788_v51  ;;  %v3810_v49 = vpack.c.bf16 %v1516_v48, %v1514_v47  ;;  %v3238_v51 = vld [vmem:[%s5659_s5 + $0x168] sm:$0xff]  ;;  %v3271_v47 = vld [vmem:[%s5659_s5 + $0x250] sm:$0xff]  ;;  %v3273_v48 = vld [vmem:[%s5659_s5 + $0x260] sm:$0xff] }
 0x25a   : > { %1491 = vmatmul.mubr.f32.gmra.mrb[14].mxu1 %v1294_v55  ;;  %v3228_v55 = vld [vmem:[%s5659_s5 + $0x158] sm:$0xf]  ;;  %v3812_v58 = vpack.c.bf16 %v3240_v52, %v3238_v51  ;;  %v3275_v52 = vld [vmem:[%s5659_s5 + $0x270] sm:$0xff] }
 0x25b   : > { %2170 = vmatprep.mubr.f32.mxu1 %v4210_v7 }
 0x25c   : > { %3791 = vmatpush1.bf16.msra.mxu0 %v3790_v54  ;;  %v3239_v54 = vld [vmem:[%s5659_s5 + $0x170] sm:$0xff] }
 0x25d   : > { %3229 = vmatprep.subr.msk.mxu0 %vm973_vm2, %v3228_v55  ;;  %v3242_v55 = vld [vmem:[%s5659_s5 + $0x188] sm:$0xff] }
 0x260   : > { %3230 = vmatpush1.msk.msra.mxu0 %vm973_vm2, %v3227_v56  ;;  %v3244_v56 = vld [vmem:[%s5659_s5 + $0x198] sm:$0xff] }
 0x261   : > { %3793 = vmatprep.subr.bf16.mxu0 %v3792_v59  ;;  %v3814_v59 = vpack.c.bf16 %v3239_v54, %v3237_v53  ;;  %v3277_v53 = vld [vmem:[%s5659_s5 + $0x280] sm:$0xff]  ;;  %v3280_v54 = vld [vmem:[%s5659_s5 + $0x298] sm:$0xff] }
 0x2ff   : > { %v1390_v60 = vpop.f32.mrb[8].mxu1 }
 0x300   : > { %v1392_v61 = vpop.f32.mrb[9].mxu1 }
 0x301   : > { %v3241_v61 = vld [vmem:[%s5659_s5 + $0x180] sm:$0xff] }
 0x303   : > { %v1395_v62 = vpop.f32.mrb[10].mxu1 }
 0x304   : > { %v1397_v63 = vpop.f32.mrb[11].mxu1 }
 0x305   : > { %v3246_v63 = vld [vmem:[%s5659_s5 + $0x1a8] sm:$0xff] }
 0x329   : > { %v1487_v0 = vpop.f32.mrb[12].mxu1 }
 0x32a   : > { %v4822_v1 = vmax.f32 %v1390_v60, %v1487_v0  ;;  %v1489_v2 = vpop.f32.mrb[13].mxu1  ;;  %v3816_v60 = vpack.c.bf16 %v3244_v56, %v3242_v55  ;;  %v3248_v0 = vld [vmem:[%s5659_s5 + $0x1b8] sm:$0xff]  ;;  %v3846_v55 = vpack.c.bf16 %v3277_v53, %v3275_v52  ;;  %v2256_v52 = vld [vmem:[%s5662_s8 + $0x8] sm:$0xff] }
 0x32b   : > { %v3820_v3 = vpack.c.bf16 %v3248_v0, %v3246_v63  ;;  %v3289_v63 = vld [vmem:[%s5659_s5 + $0x2c0] sm:$0xff]  ;;  %v3291_v0 = vld [vmem:[%s5659_s5 + $0x2d0] sm:$0xff]  ;;  %v3318_v53 = vld [vmem:[%s5661_s7 + $0x8] sm:$0x1f] }
 0x32c   : > { %v1545_v13 = vrot.slane %v4822_v1, 1  ;;  %v1746_v14 = vrot.slane %v4822_v1, 2  ;;  %v1863_v15 = vrot.slane %v4822_v1, 3  ;;  %v1980_v16 = vrot.slane %v4822_v1, 4 }
 0x32d   : > { %v1492_v5 = vpop.f32.mrb[14].mxu1 }
 0x32e   : > { %v4830_v6 = vmax.f32 %v1395_v62, %v1492_v5  ;;  %v1494_v9 = vpop.f32.mrb[15].mxu1  ;;  %v3243_v62 = vld [vmem:[%s5659_s5 + $0x190] sm:$0xff] }
 0x32f   : > { %v3818_v2 = vpack.c.bf16 %v3243_v62, %v3241_v61  ;;  %v3247_v5 = vld [vmem:[%s5659_s5 + $0x1b0] sm:$0xff]  ;;  %v3250_v9 = vld [vmem:[%s5659_s5 + $0x1c8] sm:$0xff]  ;;  %v3292_v62 = vld [vmem:[%s5659_s5 + $0x2d8] sm:$0xff] }
 0x330   : > { %v1546_v17 = vrot.slane %v4830_v6, 1  ;;  %v1747_v18 = vrot.slane %v4830_v6, 2  ;;  %v1864_v19 = vrot.slane %v4830_v6, 3  ;;  %v1981_v20 = vrot.slane %v4830_v6, 4  ;;  %v3290_v61 = vld [vmem:[%s5659_s5 + $0x2c8] sm:$0xff] }
 0x332   : > { %v1547_v25 = vsel %vm517_vm0, %v1545_v13, %v1546_v17  ;;  %v4862_v29 = vsel %vm729_vm3, %v1746_v14, %v1747_v18  ;;  %v4867_v22 = vsel %vm851_vm4, %v1863_v15, %v1864_v19  ;;  %v4872_v30 = vsel %vm973_vm2, %v1980_v16, %v1981_v20  ;;  %v3251_v13 = vld [vmem:[%s5659_s5 + $0x1d0] sm:$0xff]  ;;  %v3254_v14 = vld [vmem:[%s5659_s5 + $0x1e8] sm:$0xff]  ;;  %v3256_v15 = vld [vmem:[%s5659_s5 + $0x1f8] sm:$0xff] }
 0x333   : > { %3231 = vmatmul.mubr.msk.f32.vlgmr.msra.gmra.mrb[8].mxu0 %vm1548_vm9, %v1547_v25  ;;  %v3826_v16 = vpack.c.bf16 %v3251_v13, %v3249_v12  ;;  %v3258_v25 = vld [vmem:[%s5659_s5 + $0x208] sm:$0xf]  ;;  %v3300_v13 = vld [vmem:[%s5659_s5 + $0x318] sm:$0xff] }
 0x334   : > { %3795 = vmatpush1.bf16.msra.mxu0 %v3794_v10  ;;  %1629 = vmatprep.mubr.f32.mxu0 %v4210_v7  ;;  %v3822_v10 = vpack.c.bf16 %v3247_v5, %v3245_v4  ;;  %v3283_v4 = vld [vmem:[%s5659_s5 + $0x2b0] sm:$0xf]  ;;  %v3852_v5 = vpack.c.bf16 %v3292_v62, %v3290_v61  ;;  %v3298_v12 = vld [vmem:[%s5659_s5 + $0x308] sm:$0xff]  ;;  %v2262_v61 = vld [vmem:[%s5662_s8 + $0x38] sm:$0xff] }
 0x335   : > { %3797 = vmatprep.subr.bf16.mxu0 %v3796_v21  ;;  %v3253_v21 = vld [vmem:[%s5659_s5 + $0x1e0] sm:$0xff] }
 0x336   : > { %v3830_v24 = vpack.c.bf16 %v3255_v23, %v3253_v21  ;;  %v3302_v21 = vld [vmem:[%s5659_s5 + $0x328] sm:$0xff] }
 0x337   : > { %3232 = vmatmul.mubr.msk.f32.gmra.mrb[10].mxu0 %vm1548_vm9, %v1546_v17  ;;  %v3828_v17 = vpack.c.bf16 %v3256_v15, %v3254_v14  ;;  %v3860_v15 = vpack.c.bf16 %v3300_v13, %v3298_v12  ;;  %v2270_v12 = vld [vmem:[%s5662_s8 + $0x78] sm:$0xff] }
 0x338   : > { %3799 = vmatpush1.bf16.msra.mxu0 %v3798_v31  ;;  %1710 = vmatprep.mubr.f32.mxu0 %v4210_v7  ;;  %v3263_v31 = vld [vmem:[%s5659_s5 + $0x210] sm:$0xff] }
 0x339   : > { %3801 = vmatprep.subr.bf16.mxu0 %v3800_v34  ;;  %v3265_v34 = vld [vmem:[%s5659_s5 + $0x220] sm:$0xff] }
 0x33c   : > { %3803 = vmatpush1.bf16.msra.mxu0 %v3802_v39  ;;  %v3834_v39 = vpack.c.bf16 %v3265_v34, %v3263_v31 }
 0x33d   : > { %3805 = vmatprep.subr.bf16.mxu0 %v3804_v40  ;;  %v3836_v40 = vpack.c.bf16 %v3270_v37, %v3268_v36  ;;  %v3305_v36 = vld [vmem:[%s5659_s5 + $0x340] sm:$0xff]  ;;  %v3307_v37 = vld [vmem:[%s5659_s5 + $0x350] sm:$0xff] }
 0x340   : > { %3807 = vmatpush1.bf16.msra.mxu0 %v3806_v45  ;;  %v3838_v45 = vpack.c.bf16 %v3269_v42, %v3267_v41 }
 0x341   : > { %3809 = vmatprep.subr.bf16.mxu0 %v3808_v46  ;;  %v3840_v46 = vpack.c.bf16 %v3274_v44, %v3272_v43 }
 0x344   : > { %3811 = vmatpush1.bf16.msra.mxu0 %v3810_v49  ;;  %v3276_v49 = vld [vmem:[%s5659_s5 + $0x278] sm:$0xff] }
 0x345   : > { %3233 = vmatprep.subr.msk.mxu0 %vm973_vm2, %v1519_v50  ;;  %v3842_v50 = vpack.c.bf16 %v3273_v48, %v3271_v47 }
 0x348   : > { %3234 = vmatpush1.msk.msra.mxu0 %vm973_vm2, %v1518_v57  ;;  %v3279_v57 = vld [vmem:[%s5659_s5 + $0x290] sm:$0xff] }
 0x349   : > { %3235 = vmatmul.mubr.msk.f32.vlgmr.msra.gmra.mrb[8].mxu0 %vm1548_vm9, %v4822_v1  ;;  %3813 = vmatprep.subr.bf16.mxu0 %v3812_v58  ;;  %v3252_v1 = vld [vmem:[%s5659_s5 + $0x1d8] sm:$0xff]  ;;  %v3281_v58 = vld [vmem:[%s5659_s5 + $0x2a0] sm:$0xff] }
 0x34a   : > { %3815 = vmatpush1.bf16.msra.mxu0 %v3814_v59  ;;  %1716 = vmatprep.mubr.f32.mxu0 %v4210_v7  ;;  %v3824_v11 = vpack.c.bf16 %v3252_v1, %v3250_v9  ;;  %v3850_v59 = vpack.c.bf16 %v3281_v58, %v3279_v57  ;;  %v3854_v9 = vpack.c.bf16 %v3291_v0, %v3289_v63  ;;  %v2259_v57 = vld [vmem:[%s5662_s8 + $0x20] sm:$0xff]  ;;  %v2260_v58 = vld [vmem:[%s5662_s8 + $0x28] sm:$0xff] }
 0x34b   : > { %3817 = vmatprep.subr.bf16.mxu0 %v3816_v60  ;;  %v3284_v60 = vld [vmem:[%s5659_s5 + $0x2b8] sm:$0xf]  ;;  %v2263_v63 = vld [vmem:[%s5662_s8 + $0x40] sm:$0xff]  ;;  %v2264_v0 = vld [vmem:[%s5662_s8 + $0x48] sm:$0xff] }
 0x34d   : > { %3236 = vmatmul.mubr.msk.f32.gmra.mrb[10].mxu0 %vm1548_vm9, %v4830_v6 }
 0x34e   : > { %3819 = vmatpush1.bf16.msra.mxu0 %v3818_v2  ;;  %1823 = vmatprep.mubr.f32.mxu0 %v4210_v7  ;;  %v3294_v2 = vld [vmem:[%s5659_s5 + $0x2e8] sm:$0xff] }
 0x34f   : > { %3821 = vmatprep.subr.bf16.mxu0 %v3820_v3  ;;  %v3296_v3 = vld [vmem:[%s5659_s5 + $0x2f8] sm:$0xff] }
 0x350   : > { %v3856_v1 = vpack.c.bf16 %v3296_v3, %v3294_v2  ;;  %v3897_v2 = vpack.c.bf16 %v2264_v0, %v2263_v63  ;;  %v2265_v3 = vld [vmem:[%s5662_s8 + $0x50] sm:$0xff]  ;;  %v3346_v63 = vld [vmem:[%s5663_s9 + $0x60] sm:$0xff]  ;;  %v3347_v0 = vld [vmem:[%s5663_s9 + $0x68] sm:$0xff] }
 0x352   : > { %3823 = vmatpush1.bf16.msra.mxu0 %v3822_v10  ;;  %v3293_v10 = vld [vmem:[%s5659_s5 + $0x2e0] sm:$0xff] }
 0x353   : > { %3825 = vmatprep.subr.bf16.mxu0 %v3824_v11  ;;  %v3295_v11 = vld [vmem:[%s5659_s5 + $0x2f0] sm:$0xff] }
 0x354   : > { %v3858_v14 = vpack.c.bf16 %v3295_v11, %v3293_v10  ;;  %v2269_v11 = vld [vmem:[%s5662_s8 + $0x70] sm:$0xff] }
 0x355   : > { %v3906_v13 = vpack.c.bf16 %v2270_v12, %v2269_v11  ;;  %v2446_v12 = vld [vmem:[%s5663_s9 + $0x30] sm:$0xff] }
 0x356   : > { %3827 = vmatpush1.bf16.msra.mxu0 %v3826_v16  ;;  %v3297_v16 = vld [vmem:[%s5659_s5 + $0x300] sm:$0xff] }
 0x357   : > { %3829 = vmatprep.subr.bf16.mxu0 %v3828_v17  ;;  %v3299_v17 = vld [vmem:[%s5659_s5 + $0x310] sm:$0xff] }
 0x358   : > { %v3862_v23 = vpack.c.bf16 %v3299_v17, %v3297_v16  ;;  %v2273_v17 = vld [vmem:[%s5662_s8 + $0x90] sm:$0xff] }
 0x35a   : > { %3831 = vmatpush1.bf16.msra.mxu0 %v3830_v24 }
 0x35b   : > { %3259 = vmatprep.subr.msk.mxu0 %vm973_vm2, %v3258_v25  ;;  %v3301_v25 = vld [vmem:[%s5659_s5 + $0x320] sm:$0xff] }
 0x35c   : > { %v3866_v31 = vpack.c.bf16 %v3303_v26, %v3301_v25  ;;  %v3323_v25 = vld [vmem:[%s5662_s8 + $0xa0] sm:$0xff]  ;;  %v3324_v26 = vld [vmem:[%s5662_s8 + $0xa8] sm:$0xff] }
 0x35e   : > { %3260 = vmatpush1.msk.msra.mxu0 %vm973_vm2, %v3257_v28  ;;  %v3870_v28 = vpack.c.bf16 %v3307_v37, %v3305_v36  ;;  %v3915_v36 = vpack.c.bf16 %v3324_v26, %v3323_v25  ;;  %v3325_v37 = vld [vmem:[%s5662_s8 + $0xb0] sm:$0xff]  ;;  %v3353_v25 = vld [vmem:[%s5663_s9 + $0x98] sm:$0xff] }
 0x35f   : > { %3261 = vmatmul.mubr.msk.f32.vlgmr.msra.gmra.mrb[8].mxu0 %vm1548_vm9, %v4862_v29  ;;  %3833 = vmatprep.subr.bf16.mxu0 %v3832_v38  ;;  %v3278_v29 = vld [vmem:[%s5659_s5 + $0x288] sm:$0xff] }
 0x360   : > { %3835 = vmatpush1.bf16.msra.mxu0 %v3834_v39  ;;  %1829 = vmatprep.mubr.f32.mxu0 %v4210_v7  ;;  %v3844_v51 = vpack.c.bf16 %v3278_v29, %v3276_v49  ;;  %v3310_v38 = vld [vmem:[%s5659_s5 + $0x368] sm:$0xf]  ;;  %v3309_v39 = vld [vmem:[%s5659_s5 + $0x360] sm:$0xf] }
 0x361   : > { %3837 = vmatprep.subr.bf16.mxu0 %v3836_v40  ;;  %v2074_v40 = vld [vmem:[%s5660_s6] sm:$0x3] }
 0x362   : > { %v2079_v41 = vrot.slane %v2074_v40, %v1090_v33  ;;  %v2083_v43 = vrot.slane %v2074_v40, %v1094_v35  ;;  %v2255_v35 = vld [vmem:[%s5662_s8] sm:$0xff]  ;;  %v3328_v40 = vld [vmem:[%s5662_s8 + $0xc8] sm:$0xff] }
 0x363   : > { %3262 = vmatmul.mubr.msk.f32.gmra.mrb[10].mxu0 %vm1548_vm9, %v1747_v18  ;;  %v3282_v18 = vld [vmem:[%s5659_s5 + $0x2a8] sm:$0xff] }
 0x364   : > { %3839 = vmatpush1.bf16.msra.mxu0 %v3838_v45  ;;  %1940 = vmatprep.mubr.f32.mxu0 %v4210_v7  ;;  %v3848_v56 = vpack.c.bf16 %v3282_v18, %v3280_v54  ;;  %v3885_v54 = vpack.c.bf16 %v2256_v52, %v2255_v35  ;;  %v2257_v18 = vld [vmem:[%s5662_s8 + $0x10] sm:$0xff]  ;;  %v3340_v35 = vld [vmem:[%s5662_s8 + $0x128] sm:$0xff] }
 0x365   : > { %3841 = vmatprep.subr.bf16.mxu0 %v3840_v46 }
 0x368   : > { %3843 = vmatpush1.bf16.msra.mxu0 %v3842_v50 }
 0x369   : > { %3845 = vmatprep.subr.bf16.mxu0 %v3844_v51 }
 0x36c   : > { %3847 = vmatpush1.bf16.msra.mxu0 %v3846_v55  ;;  %v2258_v55 = vld [vmem:[%s5662_s8 + $0x18] sm:$0xff] }
 0x36d   : > { %3849 = vmatprep.subr.bf16.mxu0 %v3848_v56  ;;  %v3888_v56 = vpack.c.bf16 %v2258_v55, %v2257_v18  ;;  %v2440_v55 = vld [vmem:[%s5663_s9] sm:$0xff] }
 0x370   : > { %3851 = vmatpush1.bf16.msra.mxu0 %v3850_v59  ;;  %v3891_v59 = vpack.c.bf16 %v2260_v58, %v2259_v57  ;;  %v3344_v57 = vld [vmem:[%s5663_s9 + $0x50] sm:$0xff] }
 0x371   : > { %3285 = vmatprep.subr.msk.mxu0 %vm973_vm2, %v3284_v60  ;;  %v2261_v60 = vld [vmem:[%s5662_s8 + $0x30] sm:$0xff] }
 0x372   : > { %v3894_v62 = vpack.c.bf16 %v2262_v61, %v2261_v60  ;;  %v2442_v60 = vld [vmem:[%s5663_s9 + $0x10] sm:$0xff]  ;;  %v2443_v61 = vld [vmem:[%s5663_s9 + $0x18] sm:$0xff] }
 0x374   : > { %3286 = vmatpush1.msk.msra.mxu0 %vm973_vm2, %v3283_v4  ;;  %v2266_v4 = vld [vmem:[%s5662_s8 + $0x58] sm:$0xff] }
 0x375   : > { %3287 = vmatmul.mubr.msk.f32.vlgmr.msra.gmra.mrb[8].mxu0 %vm1548_vm9, %v4867_v22  ;;  %3853 = vmatprep.subr.bf16.mxu0 %v3852_v5  ;;  %v3304_v22 = vld [vmem:[%s5659_s5 + $0x338] sm:$0xff]  ;;  %v3900_v5 = vpack.c.bf16 %v2266_v4, %v2265_v3  ;;  %v3948_v3 = vpack.c.bf16 %v3347_v0, %v3346_v63  ;;  %v2444_v4 = vld [vmem:[%s5663_s9 + $0x20] sm:$0xff]  ;;  %v3380_v0 = vld [vmem:[%s5663_s9 + $0x150] sm:$0xff] }
 0x376   : > { %3855 = vmatpush1.bf16.msra.mxu0 %v3854_v9  ;;  %1946 = vmatprep.mubr.f32.mxu0 %v4210_v7  ;;  %v3864_v24 = vpack.c.bf16 %v3304_v22, %v3302_v21  ;;  %v2267_v9 = vld [vmem:[%s5662_s8 + $0x60] sm:$0xff]  ;;  %v2274_v21 = vld [vmem:[%s5662_s8 + $0x98] sm:$0xff] }
 0x377   : > { %3857 = vmatprep.subr.bf16.mxu0 %v3856_v1  ;;  %v2268_v1 = vld [vmem:[%s5662_s8 + $0x68] sm:$0xff]  ;;  %v3912_v22 = vpack.c.bf16 %v2274_v21, %v2273_v17  ;;  %v2448_v21 = vld [vmem:[%s5663_s9 + $0x40] sm:$0xff] }
 0x378   : > { %v3903_v10 = vpack.c.bf16 %v2268_v1, %v2267_v9  ;;  %v3348_v9 = vld [vmem:[%s5663_s9 + $0x70] sm:$0xff]  ;;  %v3349_v1 = vld [vmem:[%s5663_s9 + $0x78] sm:$0xff] }
 0x379   : > { %3288 = vmatmul.mubr.msk.f32.gmra.mrb[10].mxu0 %vm1548_vm9, %v1864_v19  ;;  %v3308_v19 = vld [vmem:[%s5659_s5 + $0x358] sm:$0xff]  ;;  %v3951_v11 = vpack.c.bf16 %v3349_v1, %v3348_v9  ;;  %v3384_v1 = vld [vmem:[%s5663_s9 + $0x170] sm:$0xff] }
 0x37a   : > { %3859 = vmatpush1.bf16.msra.mxu0 %v3858_v14  ;;  %2057 = vmatprep.mubr.f32.mxu0 %v4210_v7  ;;  %v3868_v34 = vpack.c.bf16 %v3308_v19, %v3306_v27  ;;  %v2271_v14 = vld [vmem:[%s5662_s8 + $0x80] sm:$0xff] }
 0x37b   : > { %3861 = vmatprep.subr.bf16.mxu0 %v3860_v15  ;;  %v2272_v15 = vld [vmem:[%s5662_s8 + $0x88] sm:$0xff] }
 0x37c   : > { %v3909_v16 = vpack.c.bf16 %v2272_v15, %v2271_v14  ;;  %v3350_v14 = vld [vmem:[%s5663_s9 + $0x80] sm:$0xff]  ;;  %v3351_v15 = vld [vmem:[%s5663_s9 + $0x88] sm:$0xff] }
 0x37d   : > { %v3954_v17 = vpack.c.bf16 %v3351_v15, %v3350_v14 }
 0x37e   : > { %3863 = vmatpush1.bf16.msra.mxu0 %v3862_v23 }
 0x37f   : > { %3865 = vmatprep.subr.bf16.mxu0 %v3864_v24 }
 0x382   : > { %3867 = vmatpush1.bf16.msra.mxu0 %v3866_v31 }
 0x383   : > { %3869 = vmatprep.subr.bf16.mxu0 %v3868_v34 }
 0x386   : > { %3871 = vmatpush1.bf16.msra.mxu0 %v3870_v28  ;;  %v3326_v28 = vld [vmem:[%s5662_s8 + $0xb8] sm:$0xff] }
 0x387   : > { %3311 = vmatprep.subr.msk.mxu0 %vm973_vm2, %v3310_v38  ;;  %v3918_v38 = vpack.c.bf16 %v3326_v28, %v3325_v37  ;;  %v3357_v37 = vld [vmem:[%s5663_s9 + $0xa8] sm:$0xff] }
 0x38a   : > { %3312 = vmatpush1.msk.msra.mxu0 %vm973_vm2, %v3309_v39  ;;  %v3327_v39 = vld [vmem:[%s5662_s8 + $0xc0] sm:$0xff] }
 0x38b   : > { %3313 = vmatmul.mubr.msk.f32.vlgmr.msra.gmra.mrb[8].mxu0 %vm1548_vm9, %v4872_v30  ;;  %3944 = vmatprep.subr.bf16.mxu0 %v4212_v8 }
 0x38c   : > { %2063 = vmatprep.mubr.f32.mxu0 %v4210_v7 }
 0x38f   : > { %3314 = vmatmul.mubr.msk.f32.gmra.mrb[10].mxu0 %vm1548_vm9, %v1981_v20 }
 0x390   : > { %3499 = vmatprep.mubr.msk.f32.mxu0 %vm4213_vm13, %v4210_v7 }
 0x45e   : > { %v2059_v42 = vpop.f32.mrb[8].mxu0 }
 0x45f   : > { %v2061_v30 = vpop.f32.mrb[9].mxu0  ;;  %v2086_v44 = vadd.f32 %v2079_v41, %v2059_v42  ;;  %v3329_v42 = vld [vmem:[%s5662_s8 + $0xd0] sm:$0xff] }
 0x460   : > { %v2087_v45 = vadd.f32 %v2083_v43, %v2061_v30 }
 0x461   : > { %v2090_v20 = vmax.f32 %v2086_v44, 0.0  ;;  %v3331_v44 = vld [vmem:[%s5662_s8 + $0xe0] sm:$0xff] }
 0x462   : > { %v2065_v46 = vpop.f32.mrb[10].mxu0  ;;  %v2091_v29 = vmax.f32 %v2087_v45, 0.0  ;;  %v3332_v45 = vld [vmem:[%s5662_s8 + $0xe8] sm:$0xff] }
 0x463   : > { %v2088_v47 = vadd.f32 %v2079_v41, %v2065_v46  ;;  %v2067_v48 = vpop.f32.mrb[11].mxu0  ;;  %v3921_v41 = vpack.c.bf16 %v3328_v40, %v3327_v39  ;;  %v3927_v46 = vpack.c.bf16 %v3332_v45, %v3331_v44  ;;  %v3358_v44 = vld [vmem:[%s5663_s9 + $0xb0] sm:$0xff]  ;;  %v3359_v45 = vld [vmem:[%s5663_s9 + $0xb8] sm:$0xff] }
 0x464   : > { %v2089_v6 = vadd.f32 %v2083_v43, %v2067_v48  ;;  %v3330_v43 = vld [vmem:[%s5662_s8 + $0xd8] sm:$0xff] }
 0x465   : > { %v2092_v49 = vmax.f32 %v2088_v47, 0.0  ;;  %v3924_v30 = vpack.c.bf16 %v3330_v43, %v3329_v42  ;;  %v3333_v47 = vld [vmem:[%s5662_s8 + $0xf0] sm:$0xff]  ;;  %v3334_v48 = vld [vmem:[%s5662_s8 + $0xf8] sm:$0xff]  ;;  %v3370_v42 = vld [vmem:[%s5663_s9 + $0x108] sm:$0xff] }
 0x466   : > { %v2093_v50 = vmax.f32 %v2089_v6, 0.0  ;;  %v3930_v6 = vpack.c.bf16 %v3334_v48, %v3333_v47  ;;  %v3371_v47 = vld [vmem:[%s5663_s9 + $0x110] sm:$0xff]  ;;  %v3372_v48 = vld [vmem:[%s5663_s9 + $0x118] sm:$0xff] }
 0x467   : > { %v3875_v51 = vpack.c.bf16 %v2092_v49, %v2090_v20  ;;  %v3335_v20 = vld [vmem:[%s5662_s8 + $0x100] sm:$0xff]  ;;  %v3336_v49 = vld [vmem:[%s5662_s8 + $0x108] sm:$0xff] }
 0x468   : > { %v3872_v33 = vpack.c.bf16 %v2093_v50, %v2091_v29  ;;  %v3933_v29 = vpack.c.bf16 %v3336_v49, %v3335_v20  ;;  %v3337_v50 = vld [vmem:[%s5662_s8 + $0x110] sm:$0xff]  ;;  %v3360_v20 = vld [vmem:[%s5663_s9 + $0xc0] sm:$0xff]  ;;  %v3361_v49 = vld [vmem:[%s5663_s9 + $0xc8] sm:$0xff] }
 0x46a   : > { %3874 = vmatprep.subr.msk.bf16.mxu1 %vm3873_vm11, %v3872_v33 }
 0x46b   : > { %3877 = vmatpush1.bf16.msk.msra.mxu1 %vm3873_vm11, %v3875_v51 }
 0x46c   : > { %3880 = vmatprep.subr.msk.bf16.mxu1 %vm3873_vm11, %v3872_v33 }
 0x46e   : > { %3317 = vmatmul.mubr.msk.f32.vlgmr.msra.gmra.mrb[16].mxu1 %vm2095_vm12, %v2094_v32  ;;  %v3339_v32 = vld [vmem:[%s5662_s8 + $0x120] sm:$0xff] }
 0x46f   : > { %3883 = vmatpush1.bf16.msk.msra.mxu1 %vm3873_vm11, %v3875_v51  ;;  %2246 = vmatprep.mubr.f32.mxu1 %v4210_v7  ;;  %v3338_v51 = vld [vmem:[%s5662_s8 + $0x118] sm:$0xff]  ;;  %v3939_v52 = vpack.c.bf16 %v3340_v35, %v3339_v32  ;;  %v3362_v32 = vld [vmem:[%s5663_s9 + $0xd0] sm:$0xff] }
 0x470   : > { %3884 = vmatprep.subr.bf16.mxu1 %v4212_v8  ;;  %v3936_v33 = vpack.c.bf16 %v3338_v51, %v3337_v50  ;;  %v3373_v50 = vld [vmem:[%s5663_s9 + $0x120] sm:$0xff]  ;;  %v3374_v51 = vld [vmem:[%s5663_s9 + $0x128] sm:$0xff]  ;;  %v3363_v35 = vld [vmem:[%s5663_s9 + $0xd8] sm:$0xff] }
 0x472   : > { %3321 = vmatmul.mubr.msk.f32.vlgmr.msra.gmra.mrb[18].mxu1 %vm2095_vm12, %v3318_v53  ;;  %v3341_v53 = vld [vmem:[%s5662_s8 + $0x130] sm:$0xff] }
 0x473   : > { %3886 = vmatpush1.bf16.msra.mxu1 %v3885_v54  ;;  %v3342_v54 = vld [vmem:[%s5662_s8 + $0x138] sm:$0xff] }
 0x474   : > { %3887 = vmatprep.subr.bf16.mxu1 %v4212_v8  ;;  %v3942_v18 = vpack.c.bf16 %v3342_v54, %v3341_v53  ;;  %v3375_v53 = vld [vmem:[%s5663_s9 + $0x130] sm:$0xff]  ;;  %v3376_v54 = vld [vmem:[%s5663_s9 + $0x138] sm:$0xff] }
 0x477   : > { %3889 = vmatpush1.bf16.msra.mxu1 %v3888_v56  ;;  %v2441_v56 = vld [vmem:[%s5663_s9 + $0x8] sm:$0xff] }
 0x478   : > { %3890 = vmatprep.subr.bf16.mxu1 %v4212_v8  ;;  %v3960_v58 = vpack.c.bf16 %v2441_v56, %v2440_v55  ;;  %v3364_v55 = vld [vmem:[%s5663_s9 + $0xe0] sm:$0xff]  ;;  %v3365_v56 = vld [vmem:[%s5663_s9 + $0xe8] sm:$0xff] }
 0x47b   : > { %3892 = vmatpush1.bf16.msra.mxu1 %v3891_v59  ;;  %v3345_v59 = vld [vmem:[%s5663_s9 + $0x58] sm:$0xff] }
 0x47c   : > { %3893 = vmatprep.subr.bf16.mxu1 %v4212_v8 }
 0x47f   : > { %3895 = vmatpush1.bf16.msra.mxu1 %v3894_v62  ;;  %v3945_v62 = vpack.c.bf16 %v3345_v59, %v3344_v57  ;;  %v4002_v57 = vpack.c.bf16 %v3376_v54, %v3375_v53  ;;  %v3378_v59 = vld [vmem:[%s5663_s9 + $0x140] sm:$0xff] }
 0x480   : > { %3896 = vmatprep.subr.bf16.mxu1 %v4212_v8 }
 0x481   : > { %3946 = vmatpush3.bf16.msra.mxu0 %v3945_v62 }
 0x482   : > { %3947 = vmatprep.subr.bf16.mxu0 %v4212_v8 }
 0x483   : > { %3898 = vmatpush1.bf16.msra.mxu1 %v3897_v2  ;;  %v3963_v2 = vpack.c.bf16 %v2443_v61, %v2442_v60  ;;  %v3379_v60 = vld [vmem:[%s5663_s9 + $0x148] sm:$0xff] }
 0x484   : > { %3899 = vmatprep.subr.bf16.mxu1 %v4212_v8  ;;  %v4005_v62 = vpack.c.bf16 %v3379_v60, %v3378_v59 }
 0x485   : > { %3949 = vmatpush3.bf16.msra.mxu0 %v3948_v3 }
 0x486   : > { %3950 = vmatprep.subr.bf16.mxu0 %v4212_v8 }
 0x487   : > { %3901 = vmatpush1.bf16.msra.mxu1 %v3900_v5  ;;  %v2445_v5 = vld [vmem:[%s5663_s9 + $0x28] sm:$0xff] }
 0x488   : > { %3902 = vmatprep.subr.bf16.mxu1 %v4212_v8 }
 0x489   : > { %3952 = vmatpush3.bf16.msra.mxu0 %v3951_v11 }
 0x48a   : > { %3953 = vmatprep.subr.bf16.mxu0 %v4212_v8 }
 0x48b   : > { %3904 = vmatpush1.bf16.msra.mxu1 %v3903_v10  ;;  %v3966_v10 = vpack.c.bf16 %v2445_v5, %v2444_v4  ;;  %v3382_v4 = vld [vmem:[%s5663_s9 + $0x160] sm:$0xff]  ;;  %v3383_v5 = vld [vmem:[%s5663_s9 + $0x168] sm:$0xff] }
 0x48c   : > { %3905 = vmatprep.subr.bf16.mxu1 %v4212_v8  ;;  %v4011_v9 = vpack.c.bf16 %v3383_v5, %v3382_v4  ;;  %v2967_v5 = vld [vmem:[%s5667_s13 + $0x50] sm:$0xf] }
 0x48d   : > { %3955 = vmatpush3.bf16.msra.mxu0 %v3954_v17  ;;  %v2867_v17 = vld [vmem:[%s5665_s11 + $0x8] sm:$0xff] }
 0x48e   : > { %3956 = vmatprep.subr.bf16.mxu0 %v4212_v8 }
 0x48f   : > { %3907 = vmatpush1.bf16.msra.mxu1 %v3906_v13  ;;  %v2447_v13 = vld [vmem:[%s5663_s9 + $0x38] sm:$0xff] }
 0x490   : > { %3908 = vmatprep.subr.bf16.mxu1 %v4212_v8 }
 0x493   : > { %3910 = vmatpush1.bf16.msra.mxu1 %v3909_v16  ;;  %v3969_v16 = vpack.c.bf16 %v2447_v13, %v2446_v12  ;;  %v3386_v12 = vld [vmem:[%s5663_s9 + $0x180] sm:$0xff]  ;;  %v3387_v13 = vld [vmem:[%s5663_s9 + $0x188] sm:$0xff] }
 0x494   : > { %3911 = vmatprep.subr.bf16.mxu1 %v4212_v8  ;;  %v4017_v14 = vpack.c.bf16 %v3387_v13, %v3386_v12 }
 0x497   : > { %3913 = vmatpush1.bf16.msra.mxu1 %v3912_v22  ;;  %v2449_v22 = vld [vmem:[%s5663_s9 + $0x48] sm:$0xff] }
 0x498   : > { %3914 = vmatprep.subr.bf16.mxu1 %v4212_v8 }
 0x541   : > { %v2172_v23 = vpop.f32.mrb[16].mxu1 }
 0x542   : > { %v2174_v24 = vpop.f32.mrb[17].mxu1 }
 0x545   : > { %v2248_v27 = vpop.f32.mrb[18].mxu1 }
 0x546   : > { %v2253_v19 = vmax.f32 %v2172_v23, %v2248_v27  ;;  %v2250_v31 = vpop.f32.mrb[19].mxu1  ;;  %v3972_v23 = vpack.c.bf16 %v2449_v22, %v2448_v21  ;;  %v2868_v22 = vld [vmem:[%s5665_s11 + $0x10] sm:$0xff] }
 0x547   : > { %v2254_v34 = vmax.f32 %v2174_v24, %v2250_v31  ;;  %v3352_v24 = vld [vmem:[%s5663_s9 + $0x90] sm:$0xff] }
 0x548   : > { %v3957_v26 = vpack.c.bf16 %v3353_v25, %v3352_v24  ;;  %v3367_v31 = vld [vmem:[%s5663_s9 + $0xf0] sm:$0xff]  ;;  %v2870_v25 = vld [vmem:[%s5665_s11 + $0x20] sm:$0xff] }
 0x549   : > { %3322 = vmatprep.mubr.msk.f32.mxu1 %vm525_vm1, %v2254_v34 }
 0x54a   : > { %2343 = vmatmul.mubr.f32.vlgmr.msra.gmra.mrb[20].mxu1 %v2253_v19  ;;  %3958 = vmatpush3.bf16.msra.mxu0 %v3957_v26  ;;  %v2871_v26 = vld [vmem:[%s5665_s11 + $0x28] sm:$0xff] }
 0x54b   : > { %3916 = vmatpush1.bf16.msra.mxu1 %v3915_v36  ;;  %3343 = vmatprep.mubr.msk.f32.mxu1 %vm525_vm1, %v2254_v34  ;;  %v3368_v34 = vld [vmem:[%s5663_s9 + $0xf8] sm:$0xff]  ;;  %v3356_v36 = vld [vmem:[%s5663_s9 + $0xa0] sm:$0xff] }
 0x54c   : > { %3917 = vmatprep.subr.bf16.mxu1 %v4212_v8  ;;  %3974 = vmatprep.subr.bf16.mxu0 %v4212_v8  ;;  %v3975_v43 = vpack.c.bf16 %v3357_v37, %v3356_v36  ;;  %v2874_v36 = vld [vmem:[%s5665_s11 + $0x40] sm:$0xff]  ;;  %v2875_v37 = vld [vmem:[%s5665_s11 + $0x48] sm:$0xff] }
 0x54f   : > { %3919 = vmatpush1.bf16.msra.mxu1 %v3918_v38  ;;  %v3990_v38 = vpack.c.bf16 %v3368_v34, %v3367_v31  ;;  %v2873_v31 = vld [vmem:[%s5665_s11 + $0x38] sm:$0xff] }
 0x550   : > { %3920 = vmatprep.subr.bf16.mxu1 %v4212_v8 }
 0x553   : > { %3922 = vmatpush1.bf16.msra.mxu1 %v3921_v41  ;;  %v3369_v41 = vld [vmem:[%s5663_s9 + $0x100] sm:$0xff] }
 0x554   : > { %3923 = vmatprep.subr.bf16.mxu1 %v4212_v8 }
 0x557   : > { %3925 = vmatpush1.bf16.msra.mxu1 %v3924_v30 }
 0x558   : > { %3926 = vmatprep.subr.bf16.mxu1 %v4212_v8 }
 0x55b   : > { %3928 = vmatpush1.bf16.msra.mxu1 %v3927_v46  ;;  %v3993_v46 = vpack.c.bf16 %v3370_v42, %v3369_v41  ;;  %v2878_v41 = vld [vmem:[%s5665_s11 + $0x60] sm:$0xff]  ;;  %v2879_v42 = vld [vmem:[%s5665_s11 + $0x68] sm:$0xff] }
 0x55c   : > { %3929 = vmatprep.subr.bf16.mxu1 %v4212_v8 }
 0x55f   : > { %3931 = vmatpush1.bf16.msra.mxu1 %v3930_v6  ;;  %v3978_v6 = vpack.c.bf16 %v3359_v45, %v3358_v44  ;;  %v2957_v44 = vld [vmem:[%s5667_s13] sm:$0xff]  ;;  %v2958_v45 = vld [vmem:[%s5667_s13 + $0x8] sm:$0xff] }
 0x560   : > { %3932 = vmatprep.subr.bf16.mxu1 %v4212_v8 }
 0x563   : > { %3934 = vmatpush1.bf16.msra.mxu1 %v3933_v29  ;;  %v3996_v29 = vpack.c.bf16 %v3372_v48, %v3371_v47  ;;  %v4041_v47 = vpack.c.bf16 %v2958_v45, %v2957_v44  ;;  %v2960_v48 = vld [vmem:[%s5667_s13 + $0x18] sm:$0xff] }
 0x564   : > { %3935 = vmatprep.subr.bf16.mxu1 %v4212_v8 }
 0x567   : > { %3937 = vmatpush1.bf16.msra.mxu1 %v3936_v33  ;;  %v3981_v33 = vpack.c.bf16 %v3361_v49, %v3360_v20  ;;  %v2961_v20 = vld [vmem:[%s5667_s13 + $0x20] sm:$0xff]  ;;  %v2962_v49 = vld [vmem:[%s5667_s13 + $0x28] sm:$0xff] }
 0x568   : > { %3938 = vmatprep.subr.bf16.mxu1 %v4212_v8 }
 0x56b   : > { %3940 = vmatpush1.bf16.msra.mxu1 %v3939_v52  ;;  %v3999_v52 = vpack.c.bf16 %v3374_v51, %v3373_v50  ;;  %v2963_v50 = vld [vmem:[%s5667_s13 + $0x30] sm:$0xff]  ;;  %v2964_v51 = vld [vmem:[%s5667_s13 + $0x38] sm:$0xff] }
 0x56c   : > { %3941 = vmatprep.subr.bf16.mxu1 %v4212_v8 }
 0x56f   : > { %3943 = vmatpush1.bf16.msra.mxu1 %v3942_v18  ;;  %v3984_v18 = vpack.c.bf16 %v3363_v35, %v3362_v32 }
 0x570   : > { %3959 = vmatprep.subr.bf16.mxu1 %v4212_v8 }
 0x572   : > { %2434 = vmatmul.mubr.f32.vlgmr.msra.gmra.mrb[22].mxu1 %v2253_v19 }
 0x573   : > { %3961 = vmatpush3.bf16.msra.mxu1 %v3960_v58  ;;  %3522 = vmatprep.mubr.msk.f32.mxu1 %vm4213_vm13, %v4210_v7  ;;  %v3987_v58 = vpack.c.bf16 %v3365_v56, %v3364_v55 }
 0x574   : > { %3962 = vmatprep.subr.bf16.mxu1 %v4212_v8 }
 0x577   : > { %3964 = vmatpush3.bf16.msra.mxu1 %v3963_v2  ;;  %v3381_v2 = vld [vmem:[%s5663_s9 + $0x158] sm:$0xff] }
 0x578   : > { %3965 = vmatprep.subr.bf16.mxu1 %v4212_v8  ;;  %v4008_v3 = vpack.c.bf16 %v3381_v2, %v3380_v0  ;;  %v2965_v2 = vld [vmem:[%s5667_s13 + $0x40] sm:$0xff] }
 0x57b   : > { %3967 = vmatpush3.bf16.msra.mxu1 %v3966_v10  ;;  %v3385_v10 = vld [vmem:[%s5663_s9 + $0x178] sm:$0xff] }
 0x57c   : > { %3968 = vmatprep.subr.bf16.mxu1 %v4212_v8  ;;  %v4014_v11 = vpack.c.bf16 %v3385_v10, %v3384_v1 }
 0x57f   : > { %3970 = vmatpush3.bf16.msra.mxu1 %v3969_v16  ;;  %v2866_v16 = vld [vmem:[%s5665_s11] sm:$0xff] }
 0x580   : > { %3971 = vmatprep.subr.bf16.mxu1 %v4212_v8  ;;  %v4020_v21 = vpack.c.bf16 %v2867_v17, %v2866_v16 }
 0x583   : > { %3973 = vmatpush3.bf16.msra.mxu1 %v3972_v23  ;;  %v2869_v23 = vld [vmem:[%s5665_s11 + $0x18] sm:$0xff] }
 0x584   : > { %3989 = vmatprep.subr.bf16.mxu1 %v4212_v8  ;;  %v4023_v24 = vpack.c.bf16 %v2869_v23, %v2868_v22 }
 0x61d   : > { %v2344_v27 = vpop.f32.mrb[20].mxu1 }
 0x61e   : > { %v2346_v19 = vpop.f32.mrb[21].mxu1 }
 0x61f   : > { %v2872_v19 = vld [vmem:[%s5665_s11 + $0x30] sm:$0xff] }
 0x620   : > { %v4029_v34 = vpack.c.bf16 %v2873_v31, %v2872_v19 }
 0x645   : > { %v2435_v28 = vpop.f32.mrb[22].mxu1 }
 0x646   : > { %v5391_v39 = vmax.f32 %v2344_v27, %v2435_v28  ;;  %v2437_v40 = vpop.f32.mrb[23].mxu1  ;;  %v4026_v27 = vpack.c.bf16 %v2871_v26, %v2870_v25  ;;  %v4032_v28 = vpack.c.bf16 %v2875_v37, %v2874_v36 }
 0x648   : > { %v2462_v30 = vrot.slane %v5391_v39, 1  ;;  %3523 = vmatmul.mubr.msk.f32.vlgmr.msra.gmra.mrb[24].mxu1 %vm2463_vm14, %v5391_v39  ;;  %v2704_v61 = vrot.slane %v5391_v39, 3  ;;  %v2619_v63 = vrot.slane %v5391_v39, 2  ;;  %v2789_v15 = vrot.slane %v5391_v39, 4  ;;  %v2877_v39 = vld [vmem:[%s5665_s11 + $0x58] sm:$0xff] }
 0x649   : > { %3991 = vmatpush3.bf16.msra.mxu1 %v3990_v38  ;;  %3568 = vmatprep.mubr.msk.f32.mxu1 %vm4213_vm13, %v4210_v7  ;;  %v2876_v38 = vld [vmem:[%s5665_s11 + $0x50] sm:$0xff] }
 0x64a   : > { %3500 = vmatmul.mubr.msk.f32.vlgmr.msra.gmra.mrb[12].mxu0 %vm2463_vm14, %v2462_v30  ;;  %3992 = vmatprep.subr.bf16.mxu1 %v4212_v8  ;;  %v4035_v40 = vpack.c.bf16 %v2877_v39, %v2876_v38  ;;  %v2880_v30 = vld [vmem:[%s5665_s11 + $0x70] sm:$0xff] }
 0x64b   : > { %3976 = vmatpush3.bf16.msra.mxu0 %v3975_v43  ;;  %3545 = vmatprep.mubr.msk.f32.mxu0 %vm4213_vm13, %v4210_v7  ;;  %v4038_v43 = vpack.c.bf16 %v2879_v42, %v2878_v41 }
 0x64c   : > { %3977 = vmatprep.subr.bf16.mxu0 %v4212_v8 }
 0x64d   : > { %3994 = vmatpush3.bf16.msra.mxu1 %v3993_v46  ;;  %v2959_v46 = vld [vmem:[%s5667_s13 + $0x10] sm:$0xff] }
 0x64e   : > { %3995 = vmatprep.subr.bf16.mxu1 %v4212_v8 }
 0x64f   : > { %3979 = vmatpush3.bf16.msra.mxu0 %v3978_v6  ;;  %v4044_v6 = vpack.c.bf16 %v2960_v48, %v2959_v46 }
 0x650   : > { %3980 = vmatprep.subr.bf16.mxu0 %v4212_v8 }
 0x651   : > { %3997 = vmatpush3.bf16.msra.mxu1 %v3996_v29  ;;  %v4047_v29 = vpack.c.bf16 %v2962_v49, %v2961_v20 }
 0x652   : > { %3998 = vmatprep.subr.bf16.mxu1 %v4212_v8 }
 0x653   : > { %3982 = vmatpush3.bf16.msra.mxu0 %v3981_v33  ;;  %v4050_v33 = vpack.c.bf16 %v2964_v51, %v2963_v50 }
 0x654   : > { %3983 = vmatprep.subr.bf16.mxu0 %v4212_v8 }
 0x655   : > { %4000 = vmatpush3.bf16.msra.mxu1 %v3999_v52 }
 0x656   : > { %4001 = vmatprep.subr.bf16.mxu1 %v4212_v8 }
 0x657   : > { %3985 = vmatpush3.bf16.msra.mxu0 %v3984_v18 }
 0x658   : > { %3986 = vmatprep.subr.bf16.mxu0 %v4212_v8 }
 0x659   : > { %4003 = vmatpush3.bf16.msra.mxu1 %v4002_v57 }
 0x65a   : > { %4019 = vmatprep.subr.bf16.mxu1 %v4212_v8 }
 0x65b   : > { %3988 = vmatpush3.bf16.msra.mxu0 %v3987_v58 }
 0x65c   : > { %3569 = vmatmul.mubr.msk.f32.vlgmr.msra.gmra.mrb[26].mxu1 %vm2463_vm14, %v2704_v61  ;;  %4004 = vmatprep.subr.bf16.mxu0 %v4212_v8  ;;  %v2863_v61 = vld [vmem:[%s5664_s10] sm:$0x1] }
 0x65d   : > { %3624 = vmatprep.mubr.msk.f32.mxu1 %vm4213_vm13, %v4210_v7  ;;  %4021 = vmatpush3.bf16.msra.mxu1 %v4020_v21 }
 0x65e   : > { %3546 = vmatmul.mubr.msk.f32.vlgmr.msra.gmra.mrb[14].mxu0 %vm2463_vm14, %v2619_v63  ;;  %4022 = vmatprep.subr.bf16.mxu1 %v4212_v8 }
 0x65f   : > { %4006 = vmatpush3.bf16.msra.mxu0 %v4005_v62  ;;  %3591 = vmatprep.mubr.msk.f32.mxu0 %vm4213_vm13, %v4210_v7 }
 0x660   : > { %4007 = vmatprep.subr.bf16.mxu0 %v4212_v8 }
 0x661   : > { %4024 = vmatpush3.bf16.msra.mxu1 %v4023_v24 }
 0x662   : > { %4025 = vmatprep.subr.bf16.mxu1 %v4212_v8 }
 0x663   : > { %4009 = vmatpush3.bf16.msra.mxu0 %v4008_v3  ;;  %v2966_v3 = vld [vmem:[%s5667_s13 + $0x48] sm:$0xff] }
 0x664   : > { %4010 = vmatprep.subr.bf16.mxu0 %v4212_v8  ;;  %v4053_v4 = vpack.c.bf16 %v2966_v3, %v2965_v2 }
 0x665   : > { %4027 = vmatpush3.bf16.msra.mxu1 %v4026_v27 }
 0x666   : > { %4028 = vmatprep.subr.bf16.mxu1 %v4212_v8 }
 0x667   : > { %4012 = vmatpush3.bf16.msra.mxu0 %v4011_v9  ;;  %v2881_v9 = vld [vmem:[%s5666_s12] sm:$0x1] }
 0x668   : > { %4013 = vmatprep.subr.bf16.mxu0 %v4212_v8 }
 0x669   : > { %4030 = vmatpush3.bf16.msra.mxu1 %v4029_v34 }
 0x66a   : > { %4031 = vmatprep.subr.bf16.mxu1 %v4212_v8 }
 0x66b   : > { %4015 = vmatpush3.bf16.msra.mxu0 %v4014_v11 }
 0x66c   : > { %4016 = vmatprep.subr.bf16.mxu0 %v4212_v8 }
 0x66d   : > { %4033 = vmatpush3.bf16.msra.mxu1 %v4032_v28 }
 0x66e   : > { %4034 = vmatprep.subr.bf16.mxu1 %v4212_v8 }
 0x66f   : > { %4018 = vmatpush3.bf16.msra.mxu0 %v4017_v14 }
 0x670   : > { %4040 = vmatprep.subr.bf16.mxu0 %v4212_v8 }
 0x671   : > { %4036 = vmatpush3.bf16.msra.mxu1 %v4035_v40 }
 0x672   : > { %3592 = vmatmul.mubr.msk.f32.vlgmr.msra.gmra.mrb[16].mxu0 %vm2463_vm14, %v2789_v15  ;;  %4037 = vmatprep.subr.bf16.mxu1 %v4212_v8 }
 0x673   : > { %3649 = vmatprep.mubr.msk.f32.mxu0 %vm4213_vm13, %v4210_v7  ;;  %4042 = vmatpush3.bf16.msra.mxu0 %v4041_v47 }
 0x674   : > { %4043 = vmatprep.subr.bf16.mxu0 %v4212_v8 }
 0x675   : > { %4039 = vmatpush3.bf16.msra.mxu1 %v4038_v43 }
 0x676   : > { %3622 = vmatprep.subr.mxu1 %v4210_v7 }
 0x677   : > { %4045 = vmatpush3.bf16.msra.mxu0 %v4044_v6 }
 0x678   : > { %4046 = vmatprep.subr.bf16.mxu0 %v4212_v8 }
 0x679   : > { %3623 = vmatpush3.msra.mxu1 %v2880_v30 }
 0x67b   : > { %4048 = vmatpush3.bf16.msra.mxu0 %v4047_v29 }
 0x67c   : > { %4049 = vmatprep.subr.bf16.mxu0 %v4212_v8 }
 0x67f   : > { %4051 = vmatpush3.bf16.msra.mxu0 %v4050_v33 }
 0x680   : > { %4052 = vmatprep.subr.bf16.mxu0 %v4212_v8 }
 0x683   : > { %4054 = vmatpush3.bf16.msra.mxu0 %v4053_v4 }
 0x684   : > { %3647 = vmatprep.subr.mxu0 %v4210_v7  ;;  %v2968_v7 = vld [vmem:[%s5668_s14] sm:$0x1] }
 0x687   : > { %3648 = vmatpush3.msk.msra.mxu0 %vm973_vm2, %v2967_v5 }
 0x71b   : > { %v2604_v32 = vpop.f32.mrb[24].mxu1 }
 0x71c   : > { %v3524_v35 = vpop.f32.mrb[25].mxu1 }
 0x71d   : > { %v2532_v52 = vpop.f32.mrb[12].mxu0 }
 0x71e   : > { %v2605_v53 = vadd.f32 %v2604_v32, %v2532_v52  ;;  %v3501_v54 = vpop.f32.mrb[13].mxu0 }
 0x72f   : > { %v2773_v18 = vpop.f32.mrb[26].mxu1 }
 0x730   : > { %v3570_v55 = vpop.f32.mrb[27].mxu1 }
 0x731   : > { %v2688_v56 = vpop.f32.mrb[14].mxu0 }
 0x732   : > { %v2692_v57 = vadd.f32 %v2688_v56, %v2605_v53  ;;  %v3547_v58 = vpop.f32.mrb[15].mxu0 }
 0x734   : > { %v2777_v59 = vadd.f32 %v2773_v18, %v2692_v57 }
 0x745   : > { %v2858_v60 = vpop.f32.mrb[16].mxu0 }
 0x746   : > { %v2862_v62 = vadd.f32 %v2858_v60, %v2777_v59  ;;  %v3593_v63 = vpop.f32.mrb[17].mxu0 }
 0x748   : > { %v2864_v0 = vadd.f32 %v2863_v61, %v2862_v62 }
 0x74a   : > { %v2865_v8 = vmax.f32 %v2864_v0, 0.0 }
 0x74c   : > { %3625 = vmatmul.mubr.msk.f32.vlgmr.msra.gmra.mrb[28].mxu1 %vm2882_vm15, %v2865_v8 }
 0x81f   : > { %v2952_v1 = vpop.f32.mrb[28].mxu1 }
 0x820   : > { %v2953_v10 = vadd.f32 %v2952_v1, %v2881_v9  ;;  %v3626_v11 = vpop.f32.mrb[29].mxu1 }
 0x822   : > { %v2956_v12 = vmax.f32 %v2953_v10, 0.0 }
 0x824   : > { %3650 = vmatmul.mubr.msk.f32.vlgmr.msra.gmra.mrb[18].mxu0 %vm1548_vm9, %v2956_v12 }
 0x8f7   : > { %v3041_v13 = vpop.f32.mrb[18].mxu0 }
 0x8f8   : > { %v3042_v14 = vadd.f32 %v3041_v13, %v2968_v7  ;;  %v3651_v15 = vpop.f32.mrb[19].mxu0 }
 0x8fa   : > { %3045 = vst [vmem:[%s486_s18] sm:$0x1] %v3042_v14 }
 0x8fb   : > { %4159 = shalt.err (!%p4156_p3)
}
 0x8fc   : > { %s4160_s27 = scalar_lea.hbm %s5612_s23, 16  ;;  %s4164_s18 = scalar_lea.hbm %s5669_s15, 32 }
 0x8fd   : > { %p4161_p4 = scmp.ne.s32.totalorder %s5612_s23, %s4160_s27  ;;  %p4165_p9 = scmp.lt.u32.totalorder %s5612_s23, %s5669_s15 }
 0x8fe   : > { %p4166_p10 = scmp.lt.u32.totalorder %s4164_s18, %s4160_s27  ;;  %p4168_p12 = scmp.lt.u32.totalorder %s4160_s27, %s5612_s23 }
 0x8ff   : > { %p4162_p7 = pnand %p4161_p4, %p4333_p5 }
 0x900   : > { %p4167_p11 = por %p4166_p10, %p4165_p9 }
 0x901   : > { %p4163_p8 = pneg %p4162_p7 }
 0x902   : > { %p4169_p13 = por %p4168_p12, %p4167_p11 }
 0x904   : > { %p4170_p0 = pnand %p4169_p13, %p4163_p8 }
 0x906   : > { %4173 = shalt.err (!%p4170_p0)
}
 0x907   : > { %4103 = dma.vmem_to_hbm [thread:$0]  (%p4333_p5), %s5614_s21, 16, %s5612_s23, %s3047_s20  }
 0x908 PF: > { %s5684_s29 = sld [smem:[#allocation7_spill]]  ;;  %s5685_s22 = sld [smem:[#allocation5_spill]] }
 0x90e   : > { %p4109_p1 = scmp.ge.s32.totalorder %s5684_s29, 2  ;;  %s3071_s26 = sand.u32 1, %s5685_s22  }
 0x90f   : > { %s3072_s30 = scalar_lea.sflag [#allocation3], %s3071_s26 }
 0x910   : > { %p4106_p2 = pnand %p4109_p1, %p4337_p6 }
 0x912   : > { %4191 = dma.done.wait (!%p4106_p2), %s3072_s30, 16  }
 0x913   : > { %4193 = vsyncadd (!%p4106_p2), %s3072_s30, 4294967280  ;;  %s5687_s21 = sld [smem:[#allocation8_spill]]  ;;  %s5688_s27 = sld [smem:[#allocation6_spill]] }
 0x914   : > { %s5689_s20 = sld [smem:[#allocation9_spill]]  ;;  %s5690_s18 = smov %s4200_s19 }
 0x919   : > { %p25_p3 = scmp.ge.s32.totalorder %s5687_s21, 4   ;;  %s5691_s19 = smov %s5688_s27 }
 0x91b   :  { %27 = sbr.rel (!%p25_p3) target bundleno = 3 (0x3), region = 131 }
 0x922   :  { %3076 = vsyncpa [#allocation3], 1 }
 0x923   :  { %3078 = vsyncpa [#allocation3 + $0x1], 1 }

</bundles_post_ra>
